<compile_context>
chip_gen: v6e
topology: v6e:2x2x1
jax: 0.10.0
libtpu: 0.0.40
codegen_flags: <defaults>
</compile_context>

<pallas_src>
import functools

import numpy as np
import jax
import jax.numpy as jnp
from jax.experimental import pallas as pl
from jax.experimental.pallas import tpu as pltpu

_NEG = -1e30   # additive mask; leaky_relu keeps it hugely negative -> exp == 0
LW = 128       # slab width / augmented hidden width (one lane tile)


# ----------------------------- fused Pallas kernel --------------------------

def gnn_fused_kernel(x_ref, slab_ref, ea_ref, p_ref, o_ref, *, fp, hidden, mxu_bf16):
    """Full GNNModel forward (eval mode), one launch, everything in VMEM.

    x_ref    [N, fp]      node features (feature dim zero-padded to fp)
    slab_ref [R, LW]      packed params:
                            rows 0:fp        W1_aug (cols 0:H = W1, H = W1@att_src1,
                                             H+1 = W1@att_dst1, rest 0)
                            rows fp:fp+LW    W2_aug (rows >= H are 0)
                            row  fp+LW       b1   (cols 0:H)
                            row  fp+LW+1     b2   (cols 0:H)
                            row  fp+LW+2     W_lin^T (cols 0:H)
                            row  fp+LW+3     b_lin   (col 0)
    ea_ref   [2, N, N]    additive attention bias per layer: edge-alpha at
                          edges / self-loops, -1e30 at non-edges (mask folded)
    p_ref    [G, N]       row-normalised mean-pool matrix
    o_ref    [G, T]
    """
    md = jnp.bfloat16 if mxu_bf16 else jnp.float32

    def mm(a, b):  # MXU dot, optional bf16 operands, always f32 accumulation
        return jnp.dot(a.astype(md), b.astype(md), preferred_element_type=jnp.float32)

    def gat(h_in, w_blk, bias_row, ea, relu):
        h_aug = mm(h_in, w_blk)                                # [N, LW]
        a_src = h_aug[:, hidden:hidden + 1]                    # [N, 1] (folded att reduction)
        a_dst = h_aug[:, hidden + 1:hidden + 2]                # [N, 1]
        raw = a_dst + jnp.transpose(a_src) + ea                # [N, N]; ~-1e30 off-edge
        logits = jnp.maximum(raw, 0.2 * raw)                   # leaky_relu(0.2), single VALU op
        m = jnp.max(logits, axis=-1, keepdims=True)
        p = jnp.exp(logits - m)
        alpha = p / jnp.sum(p, axis=-1, keepdims=True)         # exact reciprocal (f32)
        out = mm(alpha, h_aug) + bias_row                      # [N, LW]; cols >= H are junk/zero,
        return jnp.maximum(out, 0.0) if relu else out          # killed by zero rows of W2_aug / wl

    w1 = slab_ref[0:fp, :]                                     # [fp, LW]
    w2 = slab_ref[fp:fp + LW, :]                               # [LW, LW] (rows >= hidden are 0)
    b1 = slab_ref[fp + LW:fp + LW + 1, :]                      # [1, LW]
    b2 = slab_ref[fp + LW + 1:fp + LW + 2, :]
    wl = slab_ref[fp + LW + 2:fp + LW + 3, :]
    bl = slab_ref[fp + LW + 3:fp + LW + 4, :]

    h1 = gat(x_ref[...], w1, b1, ea_ref[0], relu=True)
    # TODO(synk): F.dropout with training=True (random masking) not implemented; eval-mode identity.
    h2 = gat(h1, w2, b2, ea_ref[1], relu=False)

    pooled = mm(p_ref[...], h2)                                # [G, LW] on MXU
    # degenerate [*,H]@[H,1] linear moved to VPU/XLU (mul + lane reduce)
    y = jnp.sum(pooled * wl, axis=-1, keepdims=True) + bl[:, 0:1]
    o_ref[...] = jnp.tanh(y)


def gnn_forward(x_pad, slab, ea_stack, pool, *, fp, hidden, target_size=1, mxu_bf16=True):
    num_graphs = pool.shape[0]
    vmem = lambda: pl.BlockSpec(memory_space=pltpu.MemorySpace.VMEM)
    kern = functools.partial(gnn_fused_kernel, fp=fp, hidden=hidden, mxu_bf16=mxu_bf16)
    return pl.pallas_call(
        kern,
        out_shape=jax.ShapeDtypeStruct((num_graphs, target_size), jnp.float32),
        in_specs=[vmem(), vmem(), vmem(), vmem()],
        out_specs=vmem(),
    )(x_pad, slab, ea_stack, pool)


# ------------------------------ host-side glue ------------------------------

def build_param_slab(W1_pad, att_src1, att_dst1, b1, W2, att_src2, att_dst2, b2,
                     W_lin, b_lin, *, fp, hidden):
    """Pack all weights into one [R, 128] f32 slab (one DMA, static in-kernel slices)."""
    def aug(W, a_s, a_d):
        W = np.asarray(W, np.float32)
        blk = np.zeros((W.shape[0], LW), np.float32)
        blk[:, :hidden] = W
        blk[:, hidden] = (W @ np.asarray(a_s, np.float32).reshape(hidden, 1))[:, 0]
        blk[:, hidden + 1] = (W @ np.asarray(a_d, np.float32).reshape(hidden, 1))[:, 0]
        return blk

    rows = fp + LW + 4
    R = ((rows + 7) // 8) * 8
    slab = np.zeros((R, LW), np.float32)
    slab[0:fp, :] = aug(W1_pad, att_src1, att_dst1)
    slab[fp:fp + hidden, :] = aug(W2, att_src2, att_dst2)        # rows fp+hidden..fp+LW stay 0
    slab[fp + LW, :hidden] = np.asarray(b1, np.float32).reshape(-1)
    slab[fp + LW + 1, :hidden] = np.asarray(b2, np.float32).reshape(-1)
    slab[fp + LW + 2, :hidden] = np.asarray(W_lin, np.float32).reshape(-1)
    slab[fp + LW + 3, 0] = float(np.asarray(b_lin).reshape(-1)[0])
    return jnp.asarray(slab)


def build_dense_edge_alpha(edge_index, edge_attr, num_nodes, W_e, att_edge):
    """Dense additive attention-bias matrix [N, N] (edge j -> i at [i, j]).

    value = edge_attr_e @ (W_e @ att_edge) at real edges,
            per-destination scatter-mean of incoming edge_attr at self-loops
            (PyG add_self_loops fill_value='mean'),
            -1e30 at non-edges / cross-graph entries (softmax mask folded in).
    """
    v_e = np.asarray(W_e @ att_edge)[:, 0]                     # [edge_dim]
    ea = np.asarray(edge_attr, dtype=np.float64)
    alpha_e = ea @ v_e                                         # [E]
    src = np.asarray(edge_index[0])
    dst = np.asarray(edge_index[1])

    sums = np.zeros((num_nodes, ea.shape[1]), np.float64)
    cnt = np.zeros((num_nodes, 1), np.float64)
    np.add.at(sums, dst, ea)
    np.add.at(cnt, dst, 1.0)
    mean_attr = sums / np.maximum(cnt, 1.0)
    alpha_self = mean_attr @ v_e                               # [N]

    EA = np.full((num_nodes, num_nodes), _NEG, np.float32)
    EA[dst, src] = alpha_e.astype(np.float32)
    idx = np.arange(num_nodes)
    EA[idx, idx] = alpha_self.astype(np.float32)
    # invariant: no fully-masked row (else softmax denom = 0 -> NaN)
    assert (EA.max(axis=1) > _NEG * 0.5).all(), "row with no unmasked attention entry"
    return jnp.asarray(EA)


def build_pool_matrix(batch, num_graphs):
    batch = np.asarray(batch)
    P = np.zeros((num_graphs, batch.shape[0]), np.float32)
    P[batch, np.arange(batch.shape[0])] = 1.0
    P = P / P.sum(axis=1, keepdims=True)
    return jnp.asarray(P)


def glorot(key, shape):
    fan_in, fan_out = shape[0], shape[1]
    limit = float(np.sqrt(6.0 / (fan_in + fan_out)))
    return jax.random.uniform(key, shape, jnp.float32, -limit, limit)


# ------------------------- pure-JAX reference (original GATConv form) -------

def gat_ref(x, W, att_src, att_dst, EA, bias, relu):
    h = x @ W
    a_src = jnp.sum(h * att_src, axis=-1, keepdims=True)
    a_dst = jnp.sum(h * att_dst, axis=-1, keepdims=True)
    raw = a_dst + a_src.T + EA
    logits = jnp.where(raw > 0, raw, 0.2 * raw)
    alpha = jax.nn.softmax(logits, axis=-1)
    out = alpha @ h + bias
    return jnp.maximum(out, 0.0) if relu else out


# ---------------------------------- main -------------------------------------

if __name__ == "__main__":
    NUM_FEATURES = 13
    FP = 16               # padded feature dim (zero pad; identical math)
    HIDDEN = 64
    TARGET = 1
    EDGE_DIM = 15
    NODES_PER_GRAPH = 8
    NUM_GRAPHS = 16       # batched so N fills the 128-lane axis
    N = NODES_PER_GRAPH * NUM_GRAPHS   # 128

    key = jax.random.PRNGKey(0)
    keys = jax.random.split(key, 20)

    # ----- synthetic graph data: 16 eight-node rings, both edge directions
    edges = []
    for g in range(NUM_GRAPHS):
        off = g * NODES_PER_GRAPH
        for i in range(NODES_PER_GRAPH):
            j = (i + 1) % NODES_PER_GRAPH
            edges.append((off + i, off + j))
            edges.append((off + j, off + i))
    edge_index = np.array(edges, dtype=np.int32).T            # [2, E] (src, dst)
    E = edge_index.shape[1]

    x = jax.random.normal(keys[0], (N, NUM_FEATURES), jnp.float32)
    edge_attr = jax.random.normal(keys[1], (E, EDGE_DIM), jnp.float32)
    batch = np.repeat(np.arange(NUM_GRAPHS), NODES_PER_GRAPH)

    # ----- parameters (shapes follow PyG GATConv heads=1 / nn.Linear)
    W1 = glorot(keys[2], (NUM_FEATURES, HIDDEN))
    att_src1 = glorot(keys[3], (1, HIDDEN))
    att_dst1 = glorot(keys[4], (1, HIDDEN))
    W_e1 = glorot(keys[5], (EDGE_DIM, HIDDEN))
    att_edge1 = glorot(keys[6], (HIDDEN, 1))
    b1 = 0.1 * jax.random.normal(keys[7], (1, HIDDEN), jnp.float32)

    W2 = glorot(keys[8], (HIDDEN, HIDDEN))
    att_src2 = glorot(keys[9], (1, HIDDEN))
    att_dst2 = glorot(keys[10], (1, HIDDEN))
    W_e2 = glorot(keys[11], (EDGE_DIM, HIDDEN))
    att_edge2 = glorot(keys[12], (HIDDEN, 1))
    b2 = 0.1 * jax.random.normal(keys[13], (1, HIDDEN), jnp.float32)

    W_lin = glorot(keys[14], (HIDDEN, TARGET))
    b_lin = 0.1 * jax.random.normal(keys[15], (1, TARGET), jnp.float32)

    # zero-pad the input feature dim 13 -> 16
    x_pad = jnp.pad(x, ((0, 0), (0, FP - NUM_FEATURES)))
    W1_pad = jnp.pad(W1, ((0, FP - NUM_FEATURES), (0, 0)))

    # ----- pack host-side: 4 inputs total (x, param slab, EA stack, pool)
    EA1 = build_dense_edge_alpha(edge_index, edge_attr, N, np.asarray(W_e1), np.asarray(att_edge1))
    EA2 = build_dense_edge_alpha(edge_index, edge_attr, N, np.asarray(W_e2), np.asarray(att_edge2))
    ea_stack = jnp.stack([EA1, EA2], axis=0)                   # [2, N, N]
    P = build_pool_matrix(batch, NUM_GRAPHS)                   # [G, N]
    slab = build_param_slab(np.asarray(W1_pad), np.asarray(att_src1), np.asarray(att_dst1),
                            np.asarray(b1), np.asarray(W2), np.asarray(att_src2),
                            np.asarray(att_dst2), np.asarray(b2),
                            np.asarray(W_lin), np.asarray(b_lin), fp=FP, hidden=HIDDEN)

    # ----- fused Pallas forward: production variant (bf16 MXU operands)
    out_bf16 = jax.block_until_ready(
        gnn_forward(x_pad, slab, ea_stack, P, fp=FP, hidden=HIDDEN,
                    target_size=TARGET, mxu_bf16=True))
    # f32-matmul variant for tight structural validation
    out_f32 = jax.block_until_ready(
        gnn_forward(x_pad, slab, ea_stack, P, fp=FP, hidden=HIDDEN,
                    target_size=TARGET, mxu_bf16=False))

    # ----- pure-JAX reference in the original (unfolded) GATConv form
    r1 = gat_ref(x, W1, att_src1, att_dst1, EA1, b1, relu=True)
    r2 = gat_ref(r1, W2, att_src2, att_dst2, EA2, b2, relu=False)
    ref = jnp.tanh((P @ r2) @ W_lin + b_lin)

    assert out_f32.shape == (NUM_GRAPHS, TARGET)
    assert out_bf16.shape == (NUM_GRAPHS, TARGET)
    # f32 kernel: validates all algebraic refactors (slab packing, att folding,
    # max-form leaky relu, collapsed tail) against the original formulation.
    np.testing.assert_allclose(np.asarray(out_f32), np.asarray(ref), rtol=5e-3, atol=5e-3)
    # bf16-MXU kernel: loose numerical sanity check only (bf16 operand rounding
    # through two attention layers); structure is proven by the f32 path above.
    np.testing.assert_allclose(np.asarray(out_bf16), np.asarray(ref), rtol=1e-1, atol=5e-2)

    print("KERNEL_OK")
</pallas_src>

<mosaic_0001>
module attributes {stable_mosaic.version = 11 : i64} {
  func.func @gnn_fused_kernel(%arg0: memref<128x16xf32, #tpu.memory_space<vmem>>, %arg1: memref<152x128xf32, #tpu.memory_space<vmem>>, %arg2: memref<2x128x128xf32, #tpu.memory_space<vmem>>, %arg3: memref<16x128xf32, #tpu.memory_space<vmem>>, %arg4: memref<16x1xf32, #tpu.memory_space<vmem>>) attributes {dimension_semantics = [], scalar_prefetch = 0 : i64, scratch_operands = 0 : i64, tpu.core_type = #tpu.core_type<tc>} {
    %c0 = arith.constant 0 : index
    %c0_0 = arith.constant 0 : index
    %0 = vector.load %arg1[%c0, %c0_0] : memref<152x128xf32, #tpu.memory_space<vmem>>, vector<16x128xf32>
    %c16 = arith.constant 16 : index
    %c0_1 = arith.constant 0 : index
    %1 = vector.load %arg1[%c16, %c0_1] : memref<152x128xf32, #tpu.memory_space<vmem>>, vector<128x128xf32>
    %c144 = arith.constant 144 : index
    %c0_2 = arith.constant 0 : index
    %2 = vector.load %arg1[%c144, %c0_2] : memref<152x128xf32, #tpu.memory_space<vmem>>, vector<1x128xf32>
    %c145 = arith.constant 145 : index
    %c0_3 = arith.constant 0 : index
    %3 = vector.load %arg1[%c145, %c0_3] : memref<152x128xf32, #tpu.memory_space<vmem>>, vector<1x128xf32>
    %c146 = arith.constant 146 : index
    %c0_4 = arith.constant 0 : index
    %4 = vector.load %arg1[%c146, %c0_4] : memref<152x128xf32, #tpu.memory_space<vmem>>, vector<1x128xf32>
    %c147 = arith.constant 147 : index
    %c0_5 = arith.constant 0 : index
    %5 = vector.load %arg1[%c147, %c0_5] : memref<152x128xf32, #tpu.memory_space<vmem>>, vector<1x128xf32>
    %c0_6 = arith.constant 0 : index
    %c0_7 = arith.constant 0 : index
    %6 = vector.load %arg0[%c0_6, %c0_7] : memref<128x16xf32, #tpu.memory_space<vmem>>, vector<128x16xf32>
    %c0_8 = arith.constant 0 : index
    %c0_9 = arith.constant 0 : index
    %c0_10 = arith.constant 0 : index
    %7 = vector.load %arg2[%c0_8, %c0_9, %c0_10] : memref<2x128x128xf32, #tpu.memory_space<vmem>>, vector<1x128x128xf32>
    %8 = vector.shape_cast %7 : vector<1x128x128xf32> to vector<128x128xf32>
    %9 = arith.truncf %6 : vector<128x16xf32> to vector<128x16xbf16>
    %10 = arith.truncf %0 : vector<16x128xf32> to vector<16x128xbf16>
    %cst = arith.constant dense<0.000000e+00> : vector<128x128xf32>
    %11 = tpu.matmul %9, %10, %cst {dimension_numbers = #tpu.dot_dimension_numbers<[1], [0], [0], [1], [0, 0, 1, 1], [], []>} : vector<128x16xbf16>, vector<16x128xbf16>, vector<128x128xf32> -> vector<128x128xf32>
    %12 = vector.extract_strided_slice %11 {offsets = [0, 64], sizes = [128, 1], strides = [1, 1]} : vector<128x128xf32> to vector<128x1xf32>
    %13 = vector.extract_strided_slice %11 {offsets = [0, 65], sizes = [128, 1], strides = [1, 1]} : vector<128x128xf32> to vector<128x1xf32>
    %14 = tpu.transpose %12, [1, 0] : vector<128x1xf32> -> vector<1x128xf32>
    %15 = vector.broadcast %13 : vector<128x1xf32> to vector<128x128xf32>
    %16 = vector.broadcast %14 : vector<1x128xf32> to vector<128x128xf32>
    %17 = arith.addf %15, %16 : vector<128x128xf32>
    %18 = arith.addf %17, %8 : vector<128x128xf32>
    %cst_11 = arith.constant 2.000000e-01 : f32
    %19 = vector.broadcast %cst_11 : f32 to vector<128x128xf32>
    %20 = arith.mulf %19, %18 : vector<128x128xf32>
    %21 = arith.maximumf %18, %20 : vector<128x128xf32>
    %cst_12 = arith.constant dense<0xFF800000> : vector<128xf32>
    %22 = vector.multi_reduction <maximumf>, %21, %cst_12 [1] : vector<128x128xf32> to vector<128xf32>
    %23 = vector.shape_cast %22 : vector<128xf32> to vector<128x1xf32>
    %24 = vector.broadcast %23 : vector<128x1xf32> to vector<128x128xf32>
    %25 = arith.subf %21, %24 : vector<128x128xf32>
    %26 = math.exp %25 : vector<128x128xf32>
    %cst_13 = arith.constant dense<0.000000e+00> : vector<128xf32>
    %27 = vector.multi_reduction <add>, %26, %cst_13 [1] : vector<128x128xf32> to vector<128xf32>
    %28 = vector.shape_cast %27 : vector<128xf32> to vector<128x1xf32>
    %29 = vector.broadcast %28 : vector<128x1xf32> to vector<128x128xf32>
    %30 = arith.divf %26, %29 : vector<128x128xf32>
    %31 = arith.truncf %30 : vector<128x128xf32> to vector<128x128xbf16>
    %32 = arith.truncf %11 : vector<128x128xf32> to vector<128x128xbf16>
    %cst_14 = arith.constant dense<0.000000e+00> : vector<128x128xf32>
    %33 = tpu.matmul %31, %32, %cst_14 {dimension_numbers = #tpu.dot_dimension_numbers<[1], [0], [0], [1], [0, 0, 1, 1], [], []>} : vector<128x128xbf16>, vector<128x128xbf16>, vector<128x128xf32> -> vector<128x128xf32>
    %34 = vector.broadcast %2 : vector<1x128xf32> to vector<128x128xf32>
    %35 = arith.addf %33, %34 : vector<128x128xf32>
    %cst_15 = arith.constant 0.000000e+00 : f32
    %36 = vector.broadcast %cst_15 : f32 to vector<128x128xf32>
    %37 = arith.maximumf %35, %36 : vector<128x128xf32>
    %c1 = arith.constant 1 : index
    %c0_16 = arith.constant 0 : index
    %c0_17 = arith.constant 0 : index
    %38 = vector.load %arg2[%c1, %c0_16, %c0_17] : memref<2x128x128xf32, #tpu.memory_space<vmem>>, vector<1x128x128xf32>
    %39 = vector.shape_cast %38 : vector<1x128x128xf32> to vector<128x128xf32>
    %40 = arith.truncf %37 : vector<128x128xf32> to vector<128x128xbf16>
    %41 = arith.truncf %1 : vector<128x128xf32> to vector<128x128xbf16>
    %cst_18 = arith.constant dense<0.000000e+00> : vector<128x128xf32>
    %42 = tpu.matmul %40, %41, %cst_18 {dimension_numbers = #tpu.dot_dimension_numbers<[1], [0], [0], [1], [0, 0, 1, 1], [], []>} : vector<128x128xbf16>, vector<128x128xbf16>, vector<128x128xf32> -> vector<128x128xf32>
    %43 = vector.extract_strided_slice %42 {offsets = [0, 64], sizes = [128, 1], strides = [1, 1]} : vector<128x128xf32> to vector<128x1xf32>
    %44 = vector.extract_strided_slice %42 {offsets = [0, 65], sizes = [128, 1], strides = [1, 1]} : vector<128x128xf32> to vector<128x1xf32>
    %45 = tpu.transpose %43, [1, 0] : vector<128x1xf32> -> vector<1x128xf32>
    %46 = vector.broadcast %44 : vector<128x1xf32> to vector<128x128xf32>
    %47 = vector.broadcast %45 : vector<1x128xf32> to vector<128x128xf32>
    %48 = arith.addf %46, %47 : vector<128x128xf32>
    %49 = arith.addf %48, %39 : vector<128x128xf32>
    %cst_19 = arith.constant 2.000000e-01 : f32
    %50 = vector.broadcast %cst_19 : f32 to vector<128x128xf32>
    %51 = arith.mulf %50, %49 : vector<128x128xf32>
    %52 = arith.maximumf %49, %51 : vector<128x128xf32>
    %cst_20 = arith.constant dense<0xFF800000> : vector<128xf32>
    %53 = vector.multi_reduction <maximumf>, %52, %cst_20 [1] : vector<128x128xf32> to vector<128xf32>
    %54 = vector.shape_cast %53 : vector<128xf32> to vector<128x1xf32>
    %55 = vector.broadcast %54 : vector<128x1xf32> to vector<128x128xf32>
    %56 = arith.subf %52, %55 : vector<128x128xf32>
    %57 = math.exp %56 : vector<128x128xf32>
    %cst_21 = arith.constant dense<0.000000e+00> : vector<128xf32>
    %58 = vector.multi_reduction <add>, %57, %cst_21 [1] : vector<128x128xf32> to vector<128xf32>
    %59 = vector.shape_cast %58 : vector<128xf32> to vector<128x1xf32>
    %60 = vector.broadcast %59 : vector<128x1xf32> to vector<128x128xf32>
    %61 = arith.divf %57, %60 : vector<128x128xf32>
    %62 = arith.truncf %61 : vector<128x128xf32> to vector<128x128xbf16>
    %63 = arith.truncf %42 : vector<128x128xf32> to vector<128x128xbf16>
    %cst_22 = arith.constant dense<0.000000e+00> : vector<128x128xf32>
    %64 = tpu.matmul %62, %63, %cst_22 {dimension_numbers = #tpu.dot_dimension_numbers<[1], [0], [0], [1], [0, 0, 1, 1], [], []>} : vector<128x128xbf16>, vector<128x128xbf16>, vector<128x128xf32> -> vector<128x128xf32>
    %65 = vector.broadcast %3 : vector<1x128xf32> to vector<128x128xf32>
    %66 = arith.addf %64, %65 : vector<128x128xf32>
    %c0_23 = arith.constant 0 : index
    %c0_24 = arith.constant 0 : index
    %67 = vector.load %arg3[%c0_23, %c0_24] : memref<16x128xf32, #tpu.memory_space<vmem>>, vector<16x128xf32>
    %68 = arith.truncf %67 : vector<16x128xf32> to vector<16x128xbf16>
    %69 = arith.truncf %66 : vector<128x128xf32> to vector<128x128xbf16>
    %cst_25 = arith.constant dense<0.000000e+00> : vector<16x128xf32>
    %70 = tpu.matmul %68, %69, %cst_25 {dimension_numbers = #tpu.dot_dimension_numbers<[1], [0], [0], [1], [0, 0, 1, 1], [], []>} : vector<16x128xbf16>, vector<128x128xbf16>, vector<16x128xf32> -> vector<16x128xf32>
    %71 = vector.broadcast %4 : vector<1x128xf32> to vector<16x128xf32>
    %72 = arith.mulf %70, %71 : vector<16x128xf32>
    %cst_26 = arith.constant dense<0.000000e+00> : vector<16xf32>
    %73 = vector.multi_reduction <add>, %72, %cst_26 [1] : vector<16x128xf32> to vector<16xf32>
    %74 = vector.shape_cast %73 : vector<16xf32> to vector<16x1xf32>
    %75 = vector.extract_strided_slice %5 {offsets = [0, 0], sizes = [1, 1], strides = [1, 1]} : vector<1x128xf32> to vector<1x1xf32>
    %76 = vector.broadcast %75 : vector<1x1xf32> to vector<16x1xf32>
    %77 = arith.addf %74, %76 : vector<16x1xf32>
    %78 = math.tanh %77 : vector<16x1xf32>
    %c0_27 = arith.constant 0 : index
    %c0_28 = arith.constant 0 : index
    %79 = vector.load %arg4[%c0_27, %c0_28] : memref<16x1xf32, #tpu.memory_space<vmem>>, vector<16x1xf32>
    tpu.vector_store %arg4[%c0_27, %c0_28], %78 {strides = array<i32>} : memref<16x1xf32, #tpu.memory_space<vmem>>, vector<16x1xf32>,
    return
  }
}

</mosaic_0001>

<bundles_post_ra>
// kernel: tpu_custom_call.1
= control target key start
LH: loop header
LB: loop body
LE: loop exit
PB: predicated region body
PF: predicated region fallthrough
CT: control target
= control target key end

     0   :  { %9 = vsyncpa [#allocation3], 0  ;;  %s2288_s0 = inlined_call_operand.vmem [shape: f32[128,16], index: 0, kind: input, shape index: {}]   ;;  %s2289_s1 = inlined_call_operand.hbm [shape: f32[152,128], index: 1, kind: input, shape index: {}]   ;;  %s2290_s2 = inlined_call_operand.hbm [shape: f32[2,128,128], index: 2, kind: input, shape index: {}]   ;;  %s2291_s3 = inlined_call_operand.vmem [shape: f32[16,128], index: 3, kind: input, shape index: {}]   ;;  %s2292_s4 = inlined_call_operand.vmem [shape: f32[16,1], index: 4, kind: output, shape index: {}]  }
   0x1   :  { %10 = vsyncpa [#allocation5], 0  ;;  %s1832_s15 = smov [#allocation2]  }
   0x2   :  { %s18_s16 = sshll.u32 %s1832_s15, 4  ;;  %s19_s16 = int_to_ptr.vmem [resolvable:$true] %s18_s16 }
   0x3   :  { %s1796_s17 = scalar_lea.vmem %s19_s16, 2432  ;;  %p1801_p1 = scmp.lt.s32.totalorder %s19_s16, %s19_s16 }
   0x4   :  { %p1797_p0 = scmp.ne.s32.totalorder %s19_s16, %s1796_s17  ;;  %p1802_p2 = scmp.lt.s32.totalorder %s1796_s17, %s1796_s17 }
   0x6   :  { %p1803_p3 = por %p1802_p2, %p1801_p1 }
   0x8   :  { %p1804_p4 = pnand %p1803_p3, %p1797_p0 }
   0xa   :  { %1807 = shalt.err (!%p1804_p4)
}
   0xb   :  { %s1833_s18 = smov 128   ;;  %s1834_s19 = smov 8  }
   0xc   :  { %24 = dma.hbm_to_vmem [thread:$0]  %s2289_s1, 2432, %s19_s16, [#allocation3], %s1833_s18, %s1833_s18, %s1834_s19  }
   0xd   :  { %s1835_s22 = smov [#allocation4]  }
   0xe   :  { %s30_s23 = sshll.u32 %s1835_s22, 4  ;;  %s31_s23 = int_to_ptr.vmem [resolvable:$true] %s30_s23 }
   0xf   :  { %s1816_s24 = scalar_lea.vmem %s31_s23, 4096  ;;  %p1821_p6 = scmp.lt.s32.totalorder %s31_s23, %s31_s23 }
  0x10   :  { %p1817_p5 = scmp.ne.s32.totalorder %s31_s23, %s1816_s24  ;;  %p1822_p7 = scmp.lt.s32.totalorder %s1816_s24, %s1816_s24 }
  0x12   :  { %p1823_p8 = por %p1822_p7, %p1821_p6 }
  0x14   :  { %p1824_p9 = pnand %p1823_p8, %p1817_p5 }
  0x16   :  { %1827 = shalt.err (!%p1824_p9)
}
  0x17   :  { %36 = dma.hbm_to_vmem [thread:$0]  %s2290_s2, 4096, %s31_s23, [#allocation5], %s1833_s18, %s1833_s18, %s1834_s19  }
  0x18   :  { %1828 = dma.done.wait [#allocation3], 2432  }
  0x19   :  { %1829 = vsyncadd [#allocation3], 4294964864 }
  0x1a   :  { %1830 = dma.done.wait [#allocation5], 4096  }
  0x1b   :  { %1831 = vsyncadd [#allocation5], 4294963200  ;;  %v46_v0 = vld [vmem:[#allocation2] sm:$0xff]  ;;  %v47_v1 = vld [vmem:[#allocation2 + $0x8] sm:$0xff]  ;;  %vm109_vm0 = vcmask 130048   ;;  %v1836_v27 = vmov 65  }
  0x1c   :  { %v68_v2 = vld [vmem:[%s2288_s0] sm:$0xff]  ;;  %v108_v3 = vpack.c.bf16 %v47_v1, %v46_v0  ;;  %v69_v4 = vld [vmem:[%s2288_s0 + $0x8] sm:$0xff]  ;;  %v70_v5 = vld [vmem:[%s2288_s0 + $0x10] sm:$0xff]  ;;  %1655 = vset.pattern.permute.xlu1 %v1836_v27  ;;  %1654 = vset.pattern.permute.xlu0 %v1836_v27  ;;  %s1837_s30 = smov 64   ;;  %vm1839_vm1 = vmmov 0   ;;  %vm1425_vm2 = vcmask 7168  }
  0x1d   :  { %v71_v6 = vld [vmem:[%s2288_s0 + $0x18] sm:$0xff]  ;;  %v100_v7 = vpack.c.bf16 %v69_v4, %v68_v2  ;;  %v72_v8 = vld [vmem:[%s2288_s0 + $0x20] sm:$0xff]  ;;  %v73_v9 = vld [vmem:[%s2288_s0 + $0x28] sm:$0xff] }
  0x1e   :  { %1512 = vmatprep.subr.bf16.mxu0 %v108_v3  ;;  %v101_v10 = vpack.c.bf16 %v71_v6, %v70_v5  ;;  %v102_v11 = vpack.c.bf16 %v73_v9, %v72_v8  ;;  %v74_v12 = vld [vmem:[%s2288_s0 + $0x30] sm:$0xff]  ;;  %v75_v13 = vld [vmem:[%s2288_s0 + $0x38] sm:$0xff]  ;;  %v76_v14 = vld [vmem:[%s2288_s0 + $0x40] sm:$0xff] }
  0x1f   :  { %1513 = vmatpush3.bf16.msra.mxu0 %v108_v3  ;;  %1514 = vmatprep.mubr.msk.bf16.mxu0 %vm109_vm0, %v100_v7  ;;  %v77_v15 = vld [vmem:[%s2288_s0 + $0x48] sm:$0xff]  ;;  %v103_v16 = vpack.c.bf16 %v75_v13, %v74_v12  ;;  %v78_v18 = vld [vmem:[%s2288_s0 + $0x50] sm:$0xff]  ;;  %v79_v19 = vld [vmem:[%s2288_s0 + $0x58] sm:$0xff]  ;;  %v391_v12 = vlaneseq }
  0x20   :  { %v104_v17 = vpack.c.bf16 %v77_v15, %v76_v14  ;;  %v80_v20 = vld [vmem:[%s2288_s0 + $0x60] sm:$0xff]  ;;  %v81_v21 = vld [vmem:[%s2288_s0 + $0x68] sm:$0xff]  ;;  %v105_v22 = vpack.c.bf16 %v79_v19, %v78_v18  ;;  %v82_v24 = vld [vmem:[%s2288_s0 + $0x70] sm:$0xff] }
  0x21   :  { %v106_v23 = vpack.c.bf16 %v81_v21, %v80_v20  ;;  %v83_v25 = vld [vmem:[%s2288_s0 + $0x78] sm:$0xff]  ;;  %v1949_v13 = vshrl.u32 %v391_v12, 7  ;;  %v85_v19 = vld [vmem:[#allocation4 + $0x8] sm:$0xff] }
  0x22   :  { %1515 = vmatmul.mubr.msk.bf16.vlgmr.msra.gmra.mxu0 %vm109_vm0, %v101_v10  ;;  %v107_v26 = vpack.c.bf16 %v83_v25, %v82_v24  ;;  %v84_v18 = vld [vmem:[#allocation4] sm:$0xff]  ;;  %v86_v25 = vld [vmem:[#allocation4 + $0x10] sm:$0xff] }
  0x23   :  { %1518 = vmatprep.mubr.msk.bf16.mxu0 %vm109_vm0, %v102_v11  ;;  %v393_v14 = vsub.s32 0, %v1949_v13 }
  0x2a   :  { %1519 = vmatmul.mubr.msk.bf16.gmra.mxu0 %vm109_vm0, %v103_v16 }
  0x2b   :  { %1522 = vmatprep.mubr.msk.bf16.mxu0 %vm109_vm0, %v104_v17 }
  0x32   :  { %1523 = vmatmul.mubr.msk.bf16.gmra.mxu0 %vm109_vm0, %v105_v22 }
  0x33   :  { %1526 = vmatprep.mubr.msk.bf16.mxu0 %vm109_vm0, %v106_v23 }
  0x3a   :  { %1527 = vmatmul.mubr.msk.bf16.gmra.mxu0 %vm109_vm0, %v107_v26 }
  0xe2   :  { %v1516_v28 = vpop.f32.mrf.mxu0 }
  0xe3   :  { %251 = vrot.lane.b32.xlu1 %v1516_v28, %s1837_s30 }
  0xe4   :  { %v168_v29 = vpop.f32.mrf.mxu0 }
  0xe5   :  { %247 = vrot.lane.b32.xlu0 %v168_v29, %s1837_s30 }
  0xe6   :  { %v1517_v30 = vpop.f32.mrf.mxu0 }
  0xe7   :  { %253 = vrot.lane.b32.xlu1 %v1517_v30, %s1837_s30  ;;  %v612_v50 = vpack.c.bf16 %v1517_v30, %v1516_v28 }
  0xe8   :  { %v171_v31 = vpop.f32.mrf.mxu0 }
  0xe9   :  { %249 = vrot.lane.b32.xlu0 %v171_v31, %s1837_s30  ;;  %v611_v51 = vpack.c.bf16 %v171_v31, %v168_v29 }
  0xea   :  { %v1520_v32 = vpop.f32.mrf.mxu0 }
  0xec   :  { %v184_v33 = vpop.f32.mrf.mxu0 }
  0xed   :  { %255 = vrot.lane.b32.xlu0 %v184_v33, %s1837_s30 }
  0xee   :  { %v1521_v34 = vpop.f32.mrf.mxu0 }
  0xef   :  { %261 = vrot.lane.b32.xlu1 %v1521_v34, %s1837_s30  ;;  %v614_v48 = vpack.c.bf16 %v1521_v34, %v1520_v32 }
  0xf0   :  { %v187_v35 = vpop.f32.mrf.mxu0 }
  0xf1   :  { %259 = vrot.lane.b32.xlu0 %v1520_v32, %s1837_s30  ;;  %v613_v49 = vpack.c.bf16 %v187_v35, %v184_v33 }
  0xf2   :  { %v1524_v36 = vpop.f32.mrf.mxu0 }
  0xf3   :  { %257 = vrot.lane.b32.xlu1 %v187_v35, %s1837_s30 }
  0xf4   :  { %v200_v37 = vpop.f32.mrf.mxu0 }
  0xf5   :  { %263 = vrot.lane.b32.xlu0 %v200_v37, %s1837_s30 }
  0xf6   :  { %v1525_v38 = vpop.f32.mrf.mxu0 }
  0xf7   :  { %269 = vrot.lane.b32.xlu1 %v1525_v38, %s1837_s30  ;;  %v616_v46 = vpack.c.bf16 %v1525_v38, %v1524_v36 }
  0xf8   :  { %v203_v39 = vpop.f32.mrf.mxu0 }
  0xf9   :  { %267 = vrot.lane.b32.xlu0 %v1524_v36, %s1837_s30  ;;  %v615_v47 = vpack.c.bf16 %v203_v39, %v200_v37 }
  0xfa   :  { %v1528_v40 = vpop.f32.mrf.mxu0 }
  0xfb   :  { %265 = vrot.lane.b32.xlu1 %v203_v39, %s1837_s30 }
  0xfc   :  { %v216_v41 = vpop.f32.mrf.mxu0 }
  0xfd   :  { %271 = vrot.lane.b32.xlu0 %v216_v41, %s1837_s30 }
  0xfe   :  { %v1529_v42 = vpop.f32.mrf.mxu0 }
  0xff   :  { %332 = vperm.xlu1 %1655, %v171_v31   ;;  %v618_v43 = vpack.c.bf16 %v1529_v42, %v1528_v40 }
 0x100   :  { %v219_v44 = vpop.f32.mrf.mxu0 }
 0x101   :  { %275 = vrot.lane.b32.xlu0 %v1528_v40, %s1837_s30  ;;  %1530 = vmatprep.subr.bf16.mxu1 %v618_v43  ;;  %v617_v45 = vpack.c.bf16 %v219_v44, %v216_v41 }
 0x102   :  { %1531 = vmatpush3.bf16.msra.mxu1 %v618_v43  ;;  %v89_v43 = vld [vmem:[#allocation4 + $0x28] sm:$0xff] }
 0x103   :  { %336 = vperm.xlu1 %1655, %v1516_v28   ;;  %1532 = vmatprep.subr.bf16.mxu1 %v617_v45 }
 0x105   :  { %328 = vperm.xlu0 %1654, %v168_v29  }
 0x106   :  { %1533 = vmatpush3.bf16.msra.mxu1 %v617_v45 }
 0x107   :  { %344 = vperm.xlu1 %1655, %v184_v33   ;;  %1534 = vmatprep.subr.bf16.mxu1 %v616_v46 }
 0x109   :  { %340 = vperm.xlu0 %1654, %v1517_v30  }
 0x10a   :  { %1535 = vmatpush3.bf16.msra.mxu1 %v616_v46 }
 0x10b   :  { %352 = vperm.xlu1 %1655, %v1520_v32   ;;  %1536 = vmatprep.subr.bf16.mxu1 %v615_v47  ;;  %v87_v32 = vld [vmem:[#allocation4 + $0x18] sm:$0xff] }
 0x10d   :  { %348 = vperm.xlu0 %1654, %v187_v35  }
 0x10e   :  { %1537 = vmatpush3.bf16.msra.mxu1 %v615_v47 }
 0x10f   :  { %360 = vperm.xlu1 %1655, %v200_v37   ;;  %1538 = vmatprep.subr.bf16.mxu1 %v614_v48  ;;  %v88_v37 = vld [vmem:[#allocation4 + $0x20] sm:$0xff] }
 0x111   :  { %356 = vperm.xlu0 %1654, %v1521_v34  }
 0x112   :  { %1539 = vmatpush3.bf16.msra.mxu1 %v614_v48  ;;  %v90_v48 = vld [vmem:[#allocation4 + $0x30] sm:$0xff] }
 0x113   :  { %368 = vperm.xlu1 %1655, %v1524_v36   ;;  %1540 = vmatprep.subr.bf16.mxu1 %v613_v49 }
 0x115   :  { %364 = vperm.xlu0 %1654, %v203_v39  }
 0x116   :  { %1541 = vmatpush3.bf16.msra.mxu1 %v613_v49 }
 0x117   :  { %384 = vperm.xlu1 %1655, %v1528_v40   ;;  %1542 = vmatprep.subr.bf16.mxu1 %v612_v50 }
 0x119   :  { %372 = vperm.xlu0 %1654, %v1525_v38  }
 0x11a   :  { %1543 = vmatpush3.bf16.msra.mxu1 %v612_v50 }
 0x11b   :  { %376 = vperm.xlu1 %1655, %v216_v41   ;;  %1544 = vmatprep.subr.bf16.mxu1 %v611_v51 }
 0x11d   :  { %388 = vperm.xlu0 %1654, %v1529_v42  }
 0x11e   :  { %1545 = vmatpush3.bf16.msra.mxu1 %v611_v51 }
 0x11f   :  { %277 = vrot.lane.b32.xlu1 %v1529_v42, %s1837_s30 }
 0x121   :  { %380 = vperm.xlu0 %1654, %v219_v44  }
 0x123   :  { %273 = vrot.lane.b32.xlu1 %v219_v44, %s1837_s30 }
 0x155   :  { %v252_v53 = vpop.permute.xlu1 %251 }
 0x157   :  { %v248_v52 = vpop.permute.xlu0 %247 }
 0x158   :  { %295 = vxpose.xlu1.b32.start [1/16] (narrow) %v248_v52, 8 }
 0x159   :  { %v254_v55 = vpop.permute.xlu1 %253 }
 0x15b   :  { %v250_v54 = vpop.permute.xlu0 %249 }
 0x15c   :  { %296 = vxpose.xlu1.b32.cont [2/16] (narrow) %v250_v54, 8  ;;  %v91_v54 = vld [vmem:[#allocation4 + $0x38] sm:$0xff] }
 0x15f   :  { %v256_v57 = vpop.permute.xlu0 %255 }
 0x160   :  { %297 = vxpose.xlu1.b32.cont [3/16] (narrow) %v252_v53, 8 }
 0x161   :  { %v262_v56 = vpop.permute.xlu1 %261 }
 0x163   :  { %v260_v59 = vpop.permute.xlu0 %259 }
 0x164   :  { %298 = vxpose.xlu1.b32.cont [4/16] (narrow) %v254_v55, 8 }
 0x165   :  { %v258_v58 = vpop.permute.xlu1 %257 }
 0x167   :  { %v264_v62 = vpop.permute.xlu0 %263 }
 0x168   :  { %299 = vxpose.xlu1.b32.cont [5/16] (narrow) %v256_v57, 8 }
 0x169   :  { %v270_v60 = vpop.permute.xlu1 %269 }
 0x16b   :  { %v268_v1 = vpop.permute.xlu0 %267 }
 0x16c   :  { %300 = vxpose.xlu1.b32.cont [6/16] (narrow) %v258_v58, 8 }
 0x16d   :  { %v266_v61 = vpop.permute.xlu1 %265 }
 0x16f   :  { %v272_v4 = vpop.permute.xlu0 %271 }
 0x170   :  { %301 = vxpose.xlu1.b32.cont [7/16] (narrow) %v260_v59, 8 }
 0x173   :  { %v276_v11 = vpop.permute.xlu0 %275 }
 0x174   :  { %302 = vxpose.xlu1.b32.cont [8/16] (narrow) %v262_v56, 8 }
 0x178   :  { %303 = vxpose.xlu1.b32.cont [9/16] (narrow) %v264_v62, 8 }
 0x17a   :  { %v333_v63 = vpop.permute.xlu1 %332 }
 0x17c   :  { %304 = vxpose.xlu1.b32.cont [10/16] (narrow) %v266_v61, 8 }
 0x17e   :  { %v337_v0 = vpop.permute.xlu1 %336 }
 0x180   :  { %305 = vxpose.xlu1.b32.cont [11/16] (narrow) %v268_v1, 8  ;;  %v329_v17 = vpop.permute.xlu0 %328  ;;  %v93_v1 = vld [vmem:[#allocation4 + $0x48] sm:$0xff] }
 0x182   :  { %v345_v2 = vpop.permute.xlu1 %344 }
 0x184   :  { %306 = vxpose.xlu1.b32.cont [12/16] (narrow) %v270_v60, 8  ;;  %v341_v27 = vpop.permute.xlu0 %340  ;;  %v92_v60 = vld [vmem:[#allocation4 + $0x40] sm:$0xff] }
 0x186   :  { %v353_v3 = vpop.permute.xlu1 %352 }
 0x188   :  { %307 = vxpose.xlu1.b32.cont [13/16] (narrow) %v272_v4, 8  ;;  %v349_v38 = vpop.permute.xlu0 %348 }
 0x18a   :  { %v361_v5 = vpop.permute.xlu1 %360 }
 0x18c   :  { %v357_v49 = vpop.permute.xlu0 %356 }
 0x18e   :  { %v1943_v6 = vpop.permute.xlu1 %368 }
 0x190   :  { %v365_v59 = vpop.permute.xlu0 %364 }
 0x192   :  { %v1945_v7 = vpop.permute.xlu1 %384 }
 0x196   :  { %v1947_v8 = vpop.permute.xlu1 %376 }
 0x19a   :  { %v278_v9 = vpop.permute.xlu1 %277 }
 0x19e   :  { %v274_v10 = vpop.permute.xlu1 %273 }
 0x19f   :  { %308 = vxpose.xlu1.b32.cont [14/16] (narrow) %v274_v10, 8  ;;  %v94_v10 = vld [vmem:[#allocation4 + $0x50] sm:$0xff] }
 0x1a3   :  { %309 = vxpose.xlu1.b32.cont [15/16] (narrow) %v276_v11, 8 }
 0x1a7   :  { %310 = vxpose.xlu1.b32.end [16/16] (narrow) %v278_v9, 8 }
 0x1e7   :  { %v311_v15 = vpop.trf.xlu1 }
 0x1e8   :  { %v1954_v16 = vrot.slane %v311_v15, %v393_v14 }
 0x1ea   :  { %v395_v20 = vadd.f32 %v1954_v16, %v329_v17  ;;  %v396_v21 = vadd.f32 %v1954_v16, %v333_v63  ;;  %v397_v24 = vadd.f32 %v1954_v16, %v337_v0  ;;  %v398_v31 = vadd.f32 %v1954_v16, %v341_v27 }
 0x1eb   :  { %v399_v36 = vadd.f32 %v1954_v16, %v345_v2  ;;  %v400_v42 = vadd.f32 %v1954_v16, %v349_v38  ;;  %v401_v47 = vadd.f32 %v1954_v16, %v353_v3  ;;  %v402_v53 = vadd.f32 %v1954_v16, %v357_v49  ;;  %v373_v2 = vpop.permute.xlu0 %372 }
 0x1ec   :  { %v411_v22 = vadd.f32 %v395_v20, %v84_v18  ;;  %v412_v23 = vadd.f32 %v396_v21, %v85_v19  ;;  %v413_v30 = vadd.f32 %v397_v24, %v86_v25  ;;  %v414_v35 = vadd.f32 %v398_v31, %v87_v32  ;;  %v95_v19 = vld [vmem:[#allocation4 + $0x58] sm:$0xff] }
 0x1ed   :  { %v415_v41 = vadd.f32 %v399_v36, %v88_v37  ;;  %v416_v46 = vadd.f32 %v400_v42, %v89_v43  ;;  %v417_v52 = vadd.f32 %v401_v47, %v90_v48  ;;  %v418_v57 = vadd.f32 %v402_v53, %v91_v54 }
 0x1ee   :  { %v427_v26 = vmul.f32 0.2, %v411_v22  ;;  %v428_v29 = vmul.f32 0.2, %v412_v23  ;;  %v429_v34 = vmul.f32 0.2, %v413_v30  ;;  %v403_v58 = vadd.f32 %v1954_v16, %v361_v5 }
 0x1ef   :  { %v430_v40 = vmul.f32 0.2, %v414_v35  ;;  %v431_v45 = vmul.f32 0.2, %v415_v41  ;;  %v432_v51 = vmul.f32 0.2, %v416_v46  ;;  %v404_v0 = vadd.f32 %v1954_v16, %v365_v59  ;;  %v389_v18 = vpop.permute.xlu0 %388 }
 0x1f0   :  { %v1959_v28 = vmax.f32 %v411_v22, %v427_v26  ;;  %v1963_v33 = vmax.f32 %v412_v23, %v428_v29  ;;  %v1967_v39 = vmax.f32 %v413_v30, %v429_v34  ;;  %v433_v56 = vmul.f32 0.2, %v417_v52  ;;  %v96_v23 = vld [vmem:[#allocation4 + $0x60] sm:$0xff]  ;;  %v97_v30 = vld [vmem:[#allocation4 + $0x68] sm:$0xff] }
 0x1f1   :  { %v1971_v44 = vmax.f32 %v414_v35, %v430_v40  ;;  %v1975_v50 = vmax.f32 %v415_v41, %v431_v45  ;;  %v1979_v55 = vmax.f32 %v416_v46, %v432_v51  ;;  %v434_v62 = vmul.f32 0.2, %v418_v57  ;;  %v98_v35 = vld [vmem:[#allocation4 + $0x70] sm:$0xff]  ;;  %v99_v41 = vld [vmem:[#allocation4 + $0x78] sm:$0xff] }
 0x1f2   :  { %459 = vmax.xlane.f32.xlu0 %v1959_v28  ;;  %v1983_v61 = vmax.f32 %v417_v52, %v433_v56  ;;  %v419_v63 = vadd.f32 %v403_v58, %v92_v60  ;;  %v420_v9 = vadd.f32 %v404_v0, %v93_v1  ;;  %v405_v5 = vadd.f32 %v1954_v16, %v1943_v6 }
 0x1f3   :  { %v1987_v3 = vmax.f32 %v418_v57, %v434_v62  ;;  %v406_v17 = vadd.f32 %v1954_v16, %v373_v2  ;;  %v407_v6 = vadd.f32 %v1954_v16, %v1947_v8  ;;  %v381_v24 = vpop.permute.xlu0 %380  ;;  %v409_v8 = vadd.f32 %v1954_v16, %v1945_v7 }
 0x1f4   :  { %v435_v4 = vmul.f32 0.2, %v419_v63  ;;  %v436_v12 = vmul.f32 0.2, %v420_v9  ;;  %v421_v15 = vadd.f32 %v405_v5, %v94_v10  ;;  %v408_v29 = vadd.f32 %v1954_v16, %v381_v24 }
 0x1f5   :  { %v422_v22 = vadd.f32 %v406_v17, %v95_v19  ;;  %v423_v27 = vadd.f32 %v407_v6, %v96_v23  ;;  %v425_v38 = vadd.f32 %v409_v8, %v98_v35  ;;  %v410_v40 = vadd.f32 %v1954_v16, %v389_v18 }
 0x1f6   :  { %461 = vmax.xlane.f32.xlu0 %v1963_v33  ;;  %v1992_v11 = vmax.f32 %v419_v63, %v435_v4  ;;  %v1996_v20 = vmax.f32 %v420_v9, %v436_v12  ;;  %v437_v21 = vmul.f32 0.2, %v421_v15  ;;  %v424_v34 = vadd.f32 %v408_v29, %v97_v30 }
 0x1f7   :  { %v438_v26 = vmul.f32 0.2, %v422_v22  ;;  %v439_v32 = vmul.f32 0.2, %v423_v27  ;;  %v441_v43 = vmul.f32 0.2, %v425_v38  ;;  %v426_v45 = vadd.f32 %v410_v40, %v99_v41 }
 0x1f8   :  { %v2001_v25 = vmax.f32 %v421_v15, %v437_v21  ;;  %v440_v37 = vmul.f32 0.2, %v424_v34 }
 0x1f9   :  { %v2005_v31 = vmax.f32 %v422_v22, %v438_v26  ;;  %v2010_v36 = vmax.f32 %v423_v27, %v439_v32  ;;  %v2017_v46 = vmax.f32 %v425_v38, %v441_v43  ;;  %v442_v7 = vmul.f32 0.2, %v426_v45 }
 0x1fa   :  { %463 = vmax.xlane.f32.xlu0 %v1967_v39  ;;  %v2014_v42 = vmax.f32 %v424_v34, %v440_v37 }
 0x1fb   :  { %v2020_v47 = vmax.f32 %v426_v45, %v442_v7 }
 0x1fe   :  { %465 = vmax.xlane.f32.xlu0 %v1971_v44 }
 0x202   :  { %467 = vmax.xlane.f32.xlu0 %v1975_v50 }
 0x206   :  { %469 = vmax.xlane.f32.xlu0 %v1979_v55 }
 0x20a   :  { %471 = vmax.xlane.f32.xlu0 %v1983_v61 }
 0x20e   :  { %473 = vmax.xlane.f32.xlu0 %v1987_v3 }
 0x212   :  { %475 = vmax.xlane.f32.xlu0 %v1992_v11 }
 0x216   :  { %477 = vmax.xlane.f32.xlu0 %v1996_v20 }
 0x21a   :  { %479 = vmax.xlane.f32.xlu0 %v2001_v25 }
 0x21e   :  { %481 = vmax.xlane.f32.xlu0 %v2005_v31 }
 0x222   :  { %483 = vmax.xlane.f32.xlu0 %v2010_v36 }
 0x226   :  { %485 = vmax.xlane.f32.xlu0 %v2014_v42 }
 0x22a   :  { %487 = vmax.xlane.f32.xlu0 %v2017_v46 }
 0x22e   :  { %489 = vmax.xlane.f32.xlu0 %v2020_v47 }
 0x27b   :  { %v460_v48 = vpop.xlane.xlu0 %459 }
 0x27c   :  { %v491_v16 = vsub.f32 %v1959_v28, %v460_v48 }
 0x27e   :  { %v507_v49 = vmul.f32 1.442695, %v491_v16 }
 0x27f   :  { %v462_v51 = vpop.xlane.xlu0 %461 }
 0x280   :  { %1656 = vpow2.f32 %v507_v49  ;;  %v492_v52 = vsub.f32 %v1963_v33, %v462_v51  ;;  %v63_v51 = vld [vmem:[#allocation2 + $0x88] sm:$0xff] }
 0x282   :  { %v509_v53 = vmul.f32 1.442695, %v492_v52  ;;  %v60_v52 = vld [vmem:[#allocation2 + $0x70] sm:$0xff] }
 0x283   :  { %v464_v54 = vpop.xlane.xlu0 %463 }
 0x284   :  { %1658 = vpow2.f32 %v509_v53  ;;  %v493_v56 = vsub.f32 %v1967_v39, %v464_v54  ;;  %v61_v54 = vld [vmem:[#allocation2 + $0x78] sm:$0xff] }
 0x286   :  { %v511_v57 = vmul.f32 1.442695, %v493_v56  ;;  %v767_v56 = vpack.c.bf16 %v61_v54, %v60_v52 }
 0x287   :  { %v466_v58 = vpop.xlane.xlu0 %465 }
 0x288   :  { %1660 = vpow2.f32 %v511_v57  ;;  %v494_v59 = vsub.f32 %v1971_v44, %v466_v58  ;;  %v58_v57 = vld [vmem:[#allocation2 + $0x60] sm:$0xff]  ;;  %v59_v58 = vld [vmem:[#allocation2 + $0x68] sm:$0xff] }
 0x28a   :  { %v513_v60 = vmul.f32 1.442695, %v494_v59  ;;  %v766_v59 = vpack.c.bf16 %v59_v58, %v58_v57 }
 0x28b   :  { %v468_v62 = vpop.xlane.xlu0 %467 }
 0x28c   :  { %1662 = vpow2.f32 %v513_v60  ;;  %v495_v28 = vsub.f32 %v1975_v50, %v468_v62  ;;  %v56_v60 = vld [vmem:[#allocation2 + $0x50] sm:$0xff]  ;;  %v57_v62 = vld [vmem:[#allocation2 + $0x58] sm:$0xff] }
 0x28d   :  { %v2028_v63 = vpop.eup %1656 }
 0x28e   :  { %v515_v0 = vmul.f32 1.442695, %v495_v28  ;;  %539 = vadd.xlane.f32.xlu0 %v2028_v63  ;;  %v765_v28 = vpack.c.bf16 %v57_v62, %v56_v60 }
 0x28f   :  { %v470_v33 = vpop.xlane.xlu0 %469 }
 0x290   :  { %1664 = vpow2.f32 %v515_v0  ;;  %v496_v1 = vsub.f32 %v1979_v55, %v470_v33  ;;  %v54_v0 = vld [vmem:[#allocation2 + $0x40] sm:$0xff]  ;;  %v55_v33 = vld [vmem:[#allocation2 + $0x48] sm:$0xff] }
 0x291   :  { %v2032_v39 = vpop.eup %1658 }
 0x292   :  { %v517_v2 = vmul.f32 1.442695, %v496_v1  ;;  %541 = vadd.xlane.f32.xlu0 %v2032_v39  ;;  %v764_v1 = vpack.c.bf16 %v55_v33, %v54_v0 }
 0x293   :  { %v472_v44 = vpop.xlane.xlu0 %471 }
 0x294   :  { %1666 = vpow2.f32 %v517_v2  ;;  %v497_v4 = vsub.f32 %v1983_v61, %v472_v44 }
 0x295   :  { %v2036_v9 = vpop.eup %1660 }
 0x296   :  { %v519_v50 = vmul.f32 1.442695, %v497_v4  ;;  %543 = vadd.xlane.f32.xlu1 %v2036_v9 }
 0x297   :  { %v474_v5 = vpop.xlane.xlu0 %473 }
 0x298   :  { %1668 = vpow2.f32 %v519_v50  ;;  %v498_v10 = vsub.f32 %v1987_v3, %v474_v5 }
 0x299   :  { %v2040_v12 = vpop.eup %1662 }
 0x29a   :  { %v521_v55 = vmul.f32 1.442695, %v498_v10  ;;  %545 = vadd.xlane.f32.xlu0 %v2040_v12 }
 0x29b   :  { %v476_v15 = vpop.xlane.xlu0 %475 }
 0x29c   :  { %1670 = vpow2.f32 %v521_v55  ;;  %v499_v17 = vsub.f32 %v1992_v11, %v476_v15 }
 0x29d   :  { %v2044_v18 = vpop.eup %1664 }
 0x29e   :  { %v523_v61 = vmul.f32 1.442695, %v499_v17  ;;  %547 = vadd.xlane.f32.xlu0 %v2044_v18 }
 0x29f   :  { %v478_v19 = vpop.xlane.xlu0 %477 }
 0x2a0   :  { %1672 = vpow2.f32 %v523_v61  ;;  %v500_v21 = vsub.f32 %v1996_v20, %v478_v19 }
 0x2a1   :  { %v2048_v22 = vpop.eup %1666 }
 0x2a2   :  { %v525_v3 = vmul.f32 1.442695, %v500_v21  ;;  %549 = vadd.xlane.f32.xlu0 %v2048_v22 }
 0x2a3   :  { %v480_v6 = vpop.xlane.xlu0 %479 }
 0x2a4   :  { %1674 = vpow2.f32 %v525_v3  ;;  %v501_v23 = vsub.f32 %v2001_v25, %v480_v6 }
 0x2a5   :  { %v2052_v24 = vpop.eup %1668 }
 0x2a6   :  { %v527_v11 = vmul.f32 1.442695, %v501_v23  ;;  %551 = vadd.xlane.f32.xlu0 %v2052_v24 }
 0x2a7   :  { %v482_v26 = vpop.xlane.xlu0 %481 }
 0x2a8   :  { %1676 = vpow2.f32 %v527_v11  ;;  %v502_v27 = vsub.f32 %v2005_v31, %v482_v26 }
 0x2a9   :  { %v2056_v29 = vpop.eup %1670 }
 0x2aa   :  { %v529_v20 = vmul.f32 1.442695, %v502_v27  ;;  %553 = vadd.xlane.f32.xlu0 %v2056_v29 }
 0x2ab   :  { %v484_v30 = vpop.xlane.xlu0 %483 }
 0x2ac   :  { %1678 = vpow2.f32 %v529_v20  ;;  %v503_v32 = vsub.f32 %v2010_v36, %v484_v30 }
 0x2ad   :  { %v2060_v34 = vpop.eup %1672 }
 0x2ae   :  { %v531_v25 = vmul.f32 1.442695, %v503_v32  ;;  %555 = vadd.xlane.f32.xlu0 %v2060_v34 }
 0x2af   :  { %v486_v8 = vpop.xlane.xlu0 %485 }
 0x2b0   :  { %1680 = vpow2.f32 %v531_v25  ;;  %v504_v35 = vsub.f32 %v2014_v42, %v486_v8 }
 0x2b1   :  { %v2064_v37 = vpop.eup %1674 }
 0x2b2   :  { %v533_v31 = vmul.f32 1.442695, %v504_v35  ;;  %557 = vadd.xlane.f32.xlu0 %v2064_v37 }
 0x2b3   :  { %v488_v38 = vpop.xlane.xlu0 %487 }
 0x2b4   :  { %1682 = vpow2.f32 %v533_v31  ;;  %v505_v40 = vsub.f32 %v2017_v46, %v488_v38 }
 0x2b5   :  { %v2068_v41 = vpop.eup %1676 }
 0x2b6   :  { %v535_v36 = vmul.f32 1.442695, %v505_v40  ;;  %559 = vadd.xlane.f32.xlu0 %v2068_v41 }
 0x2b7   :  { %v490_v43 = vpop.xlane.xlu0 %489 }
 0x2b8   :  { %1684 = vpow2.f32 %v535_v36  ;;  %v506_v45 = vsub.f32 %v2020_v47, %v490_v43  ;;  %v62_v47 = vld [vmem:[#allocation2 + $0x80] sm:$0xff] }
 0x2b9   :  { %v2072_v7 = vpop.eup %1678  ;;  %v768_v53 = vpack.c.bf16 %v63_v51, %v62_v47 }
 0x2ba   :  { %v537_v42 = vmul.f32 1.442695, %v506_v45  ;;  %561 = vadd.xlane.f32.xlu0 %v2072_v7 }
 0x2bb   :  { %1562 = vmatprep.subr.bf16.mxu0 %v768_v53 }
 0x2bc   :  { %1686 = vpow2.f32 %v537_v42  ;;  %1563 = vmatpush3.bf16.msra.mxu0 %v768_v53 }
 0x2bd   :  { %v2075_v48 = vpop.eup %1680  ;;  %1564 = vmatprep.subr.bf16.mxu0 %v767_v56 }
 0x2be   :  { %563 = vadd.xlane.f32.xlu0 %v2075_v48 }
 0x2c0   :  { %1565 = vmatpush3.bf16.msra.mxu0 %v767_v56 }
 0x2c1   :  { %v2078_v46 = vpop.eup %1682  ;;  %1566 = vmatprep.subr.bf16.mxu0 %v766_v59 }
 0x2c2   :  { %565 = vadd.xlane.f32.xlu1 %v2078_v46 }
 0x2c4   :  { %1567 = vmatpush3.bf16.msra.mxu0 %v766_v59 }
 0x2c5   :  { %v2081_v16 = vpop.eup %1684  ;;  %1568 = vmatprep.subr.bf16.mxu0 %v765_v28 }
 0x2c6   :  { %567 = vadd.xlane.f32.xlu0 %v2081_v16 }
 0x2c8   :  { %1569 = vmatpush3.bf16.msra.mxu0 %v765_v28 }
 0x2c9   :  { %v2084_v49 = vpop.eup %1686  ;;  %1570 = vmatprep.subr.bf16.mxu0 %v764_v1 }
 0x2ca   :  { %569 = vadd.xlane.f32.xlu1 %v2084_v49 }
 0x2cc   :  { %1571 = vmatpush3.bf16.msra.mxu0 %v764_v1  ;;  %v53_v1 = vld [vmem:[#allocation2 + $0x38] sm:$0xff] }
 0x317   :  { %v540_v2 = vpop.xlane.xlu0 %539 }
 0x318   :  { %1688 = vrcp.f32 %v540_v2 }
 0x31b   :  { %v542_v44 = vpop.xlane.xlu0 %541 }
 0x31c   :  { %1690 = vrcp.f32 %v542_v44  ;;  %v50_v44 = vld [vmem:[#allocation2 + $0x20] sm:$0xff] }
 0x31f   :  { %v544_v4 = vpop.xlane.xlu1 %543 }
 0x320   :  { %1692 = vrcp.f32 %v544_v4  ;;  %v51_v4 = vld [vmem:[#allocation2 + $0x28] sm:$0xff] }
 0x323   :  { %v546_v50 = vpop.xlane.xlu0 %545 }
 0x324   :  { %1694 = vrcp.f32 %v546_v50  ;;  %v762_v50 = vpack.c.bf16 %v51_v4, %v50_v44 }
 0x325   :  { %v1689_v5 = vpop.eup %1688 }
 0x326   :  { %v572_v15 = vmul.f32 %v1689_v5, %v2028_v63 }
 0x327   :  { %v548_v10 = vpop.xlane.xlu0 %547 }
 0x328   :  { %1696 = vrcp.f32 %v548_v10 }
 0x329   :  { %v1691_v55 = vpop.eup %1690 }
 0x32a   :  { %v574_v17 = vmul.f32 %v1691_v55, %v2032_v39 }
 0x32b   :  { %v550_v61 = vpop.xlane.xlu0 %549 }
 0x32c   :  { %1698 = vrcp.f32 %v550_v61  ;;  %v603_v19 = vpack.c.bf16 %v574_v17, %v572_v15 }
 0x32d   :  { %v1693_v21 = vpop.eup %1692 }
 0x32e   :  { %1546 = vmatprep.mubr.bf16.mxu1 %v603_v19  ;;  %v576_v23 = vmul.f32 %v1693_v21, %v2036_v9 }
 0x32f   :  { %v552_v3 = vpop.xlane.xlu0 %551 }
 0x330   :  { %1700 = vrcp.f32 %v552_v3 }
 0x331   :  { %v1695_v6 = vpop.eup %1694 }
 0x332   :  { %v578_v11 = vmul.f32 %v1695_v6, %v2040_v12 }
 0x333   :  { %v554_v26 = vpop.xlane.xlu0 %553 }
 0x334   :  { %1702 = vrcp.f32 %v554_v26  ;;  %v604_v27 = vpack.c.bf16 %v578_v11, %v576_v23 }
 0x335   :  { %v1697_v20 = vpop.eup %1696 }
 0x336   :  { %1547 = vmatmul.mubr.bf16.vlgmr.msra.gmra.mxu1 %v604_v27  ;;  %v580_v39 = vmul.f32 %v1697_v20, %v2044_v18 }
 0x337   :  { %v556_v63 = vpop.xlane.xlu0 %555 }
 0x338   :  { %1704 = vrcp.f32 %v556_v63 }
 0x339   :  { %v1699_v30 = vpop.eup %1698 }
 0x33a   :  { %v582_v32 = vmul.f32 %v1699_v30, %v2048_v22 }
 0x33b   :  { %v558_v25 = vpop.xlane.xlu0 %557 }
 0x33c   :  { %1706 = vrcp.f32 %v558_v25  ;;  %v605_v8 = vpack.c.bf16 %v582_v32, %v580_v39 }
 0x33d   :  { %v1701_v35 = vpop.eup %1700 }
 0x33e   :  { %1550 = vmatprep.mubr.bf16.mxu1 %v605_v8  ;;  %v584_v12 = vmul.f32 %v1701_v35, %v2052_v24 }
 0x33f   :  { %v560_v9 = vpop.xlane.xlu0 %559 }
 0x340   :  { %1708 = vrcp.f32 %v560_v9 }
 0x341   :  { %v1703_v31 = vpop.eup %1702 }
 0x342   :  { %v586_v38 = vmul.f32 %v1703_v31, %v2056_v29 }
 0x343   :  { %v562_v40 = vpop.xlane.xlu0 %561 }
 0x344   :  { %1710 = vrcp.f32 %v562_v40  ;;  %v606_v36 = vpack.c.bf16 %v586_v38, %v584_v12 }
 0x345   :  { %v1705_v43 = vpop.eup %1704 }
 0x346   :  { %1551 = vmatmul.mubr.bf16.gmra.mxu1 %v606_v36  ;;  %v588_v22 = vmul.f32 %v1705_v43, %v2060_v34 }
 0x347   :  { %v564_v18 = vpop.xlane.xlu0 %563 }
 0x348   :  { %1712 = vrcp.f32 %v564_v18 }
 0x349   :  { %v1707_v45 = vpop.eup %1706 }
 0x34a   :  { %v590_v42 = vmul.f32 %v1707_v45, %v2064_v37 }
 0x34b   :  { %v566_v47 = vpop.xlane.xlu1 %565 }
 0x34c   :  { %1714 = vrcp.f32 %v566_v47  ;;  %v607_v51 = vpack.c.bf16 %v590_v42, %v588_v22 }
 0x34d   :  { %v1709_v52 = vpop.eup %1708 }
 0x34e   :  { %1554 = vmatprep.mubr.bf16.mxu1 %v607_v51  ;;  %v592_v29 = vmul.f32 %v1709_v52, %v2068_v41 }
 0x34f   :  { %v568_v24 = vpop.xlane.xlu0 %567 }
 0x350   :  { %1716 = vrcp.f32 %v568_v24 }
 0x351   :  { %v1711_v53 = vpop.eup %1710 }
 0x352   :  { %v594_v54 = vmul.f32 %v1711_v53, %v2072_v7  ;;  %v52_v7 = vld [vmem:[#allocation2 + $0x30] sm:$0xff] }
 0x353   :  { %v570_v56 = vpop.xlane.xlu1 %569  ;;  %v763_v2 = vpack.c.bf16 %v53_v1, %v52_v7 }
 0x354   :  { %1718 = vrcp.f32 %v570_v56  ;;  %v608_v57 = vpack.c.bf16 %v594_v54, %v592_v29 }
 0x355   :  { %v1713_v58 = vpop.eup %1712  ;;  %1572 = vmatprep.subr.bf16.mxu0 %v763_v2 }
 0x356   :  { %1555 = vmatmul.mubr.bf16.gmra.mxu1 %v608_v57  ;;  %v596_v37 = vmul.f32 %v1713_v58, %v2075_v48  ;;  %1573 = vmatpush3.bf16.msra.mxu0 %v763_v2  ;;  %v48_v48 = vld [vmem:[#allocation2 + $0x10] sm:$0xff] }
 0x357   :  { %1574 = vmatprep.subr.bf16.mxu0 %v762_v50 }
 0x359   :  { %v1715_v34 = vpop.eup %1714 }
 0x35a   :  { %v598_v59 = vmul.f32 %v1715_v34, %v2078_v46  ;;  %v49_v46 = vld [vmem:[#allocation2 + $0x18] sm:$0xff]  ;;  %1575 = vmatpush3.bf16.msra.mxu0 %v762_v50 }
 0x35b   :  { %v761_v5 = vpack.c.bf16 %v49_v46, %v48_v48 }
 0x35c   :  { %v609_v60 = vpack.c.bf16 %v598_v59, %v596_v37 }
 0x35d   :  { %v1717_v62 = vpop.eup %1716  ;;  %1576 = vmatprep.subr.bf16.mxu0 %v761_v5 }
 0x35e   :  { %1558 = vmatprep.mubr.bf16.mxu1 %v609_v60  ;;  %v600_v0 = vmul.f32 %v1717_v62, %v2081_v16  ;;  %1577 = vmatpush3.bf16.msra.mxu0 %v761_v5 }
 0x361   :  { %v1719_v28 = vpop.eup %1718 }
 0x362   :  { %v602_v41 = vmul.f32 %v1719_v28, %v2084_v49  ;;  %v1442_v49 = vld [vmem:[#allocation2 + $0x90] ss:$0 sm:$0xff] }
 0x364   :  { %v610_v33 = vpack.c.bf16 %v602_v41, %v600_v0 }
 0x366   :  { %1559 = vmatmul.mubr.bf16.gmra.mxu1 %v610_v33 }
 0x3f6   :  { %v1548_v16 = vpop.f32.mrf.mxu1 }
 0x3f7   :  { %v666_v61 = vadd.f32 %v1548_v16, %v1442_v49 }
 0x3f8   :  { %v657_v10 = vpop.f32.mrf.mxu1 }
 0x3f9   :  { %v658_v15 = vadd.f32 %v1442_v49, %v657_v10  ;;  %v722_v11 = vmax.f32 %v666_v61, 0.0 }
 0x3fa   :  { %v1549_v55 = vpop.f32.mrf.mxu1 }
 0x3fb   :  { %v669_v17 = vadd.f32 %v1549_v55, %v1442_v49  ;;  %v720_v6 = vmax.f32 %v658_v15, 0.0 }
 0x3fc   :  { %v660_v19 = vpop.f32.mrf.mxu1 }
 0x3fd   :  { %v661_v21 = vadd.f32 %v1442_v49, %v660_v19  ;;  %v723_v3 = vmax.f32 %v669_v17, 0.0 }
 0x3ff   :  { %v721_v23 = vmax.f32 %v661_v21, 0.0  ;;  %v754_v27 = vpack.c.bf16 %v723_v3, %v722_v11 }
 0x401   :  { %v753_v26 = vpack.c.bf16 %v721_v23, %v720_v6 }
 0x403   :  { %1578 = vmatprep.mubr.bf16.mxu0 %v753_v26 }
 0x404   :  { %1579 = vmatmul.mubr.bf16.vlgmr.msra.gmra.mxu0 %v754_v27 }
 0x406   :  { %v1552_v20 = vpop.f32.mrf.mxu1 }
 0x407   :  { %v682_v25 = vadd.f32 %v1552_v20, %v1442_v49 }
 0x408   :  { %v673_v63 = vpop.f32.mrf.mxu1 }
 0x409   :  { %v674_v39 = vadd.f32 %v1442_v49, %v673_v63  ;;  %v726_v38 = vmax.f32 %v682_v25, 0.0 }
 0x40a   :  { %v1553_v30 = vpop.f32.mrf.mxu1 }
 0x40b   :  { %v685_v32 = vadd.f32 %v1553_v30, %v1442_v49  ;;  %v724_v31 = vmax.f32 %v674_v39, 0.0 }
 0x40c   :  { %v676_v8 = vpop.f32.mrf.mxu1 }
 0x40d   :  { %v677_v35 = vadd.f32 %v1442_v49, %v676_v8  ;;  %v727_v9 = vmax.f32 %v685_v32, 0.0 }
 0x40f   :  { %v725_v12 = vmax.f32 %v677_v35, 0.0  ;;  %v756_v36 = vpack.c.bf16 %v727_v9, %v726_v38 }
 0x411   :  { %v755_v40 = vpack.c.bf16 %v725_v12, %v724_v31 }
 0x413   :  { %1582 = vmatprep.mubr.bf16.mxu0 %v755_v40 }
 0x414   :  { %1583 = vmatmul.mubr.bf16.gmra.mxu0 %v756_v36 }
 0x416   :  { %v1556_v43 = vpop.f32.mrf.mxu1 }
 0x417   :  { %v698_v47 = vadd.f32 %v1556_v43, %v1442_v49 }
 0x418   :  { %v689_v18 = vpop.f32.mrf.mxu1 }
 0x419   :  { %v690_v22 = vadd.f32 %v1442_v49, %v689_v18  ;;  %v730_v54 = vmax.f32 %v698_v47, 0.0 }
 0x41a   :  { %v1557_v45 = vpop.f32.mrf.mxu1 }
 0x41b   :  { %v701_v42 = vadd.f32 %v1557_v45, %v1442_v49  ;;  %v728_v53 = vmax.f32 %v690_v22, 0.0 }
 0x41c   :  { %v692_v51 = vpop.f32.mrf.mxu1 }
 0x41d   :  { %v693_v52 = vadd.f32 %v1442_v49, %v692_v51  ;;  %v731_v24 = vmax.f32 %v701_v42, 0.0 }
 0x41f   :  { %v729_v29 = vmax.f32 %v693_v52, 0.0  ;;  %v758_v57 = vpack.c.bf16 %v731_v24, %v730_v54 }
 0x421   :  { %v757_v56 = vpack.c.bf16 %v729_v29, %v728_v53 }
 0x423   :  { %1586 = vmatprep.mubr.bf16.mxu0 %v757_v56 }
 0x424   :  { %1587 = vmatmul.mubr.bf16.gmra.mxu0 %v758_v57 }
 0x426   :  { %v1560_v58 = vpop.f32.mrf.mxu1 }
 0x427   :  { %v714_v62 = vadd.f32 %v1560_v58, %v1442_v49 }
 0x428   :  { %v705_v34 = vpop.f32.mrf.mxu1 }
 0x429   :  { %v706_v59 = vadd.f32 %v1442_v49, %v705_v34  ;;  %v734_v1 = vmax.f32 %v714_v62, 0.0 }
 0x42a   :  { %v1561_v37 = vpop.f32.mrf.mxu1 }
 0x42b   :  { %v717_v60 = vadd.f32 %v1561_v37, %v1442_v49  ;;  %v732_v33 = vmax.f32 %v706_v59, 0.0  ;;  %v737_v59 = vld [vmem:[#allocation4 + $0x80] sm:$0xff] }
 0x42c   :  { %v708_v28 = vpop.f32.mrf.mxu1 }
 0x42d   :  { %v709_v0 = vadd.f32 %v1442_v49, %v708_v28  ;;  %v735_v41 = vmax.f32 %v717_v60, 0.0  ;;  %v738_v60 = vld [vmem:[#allocation4 + $0x88] sm:$0xff] }
 0x42f   :  { %v733_v7 = vmax.f32 %v709_v0, 0.0  ;;  %v760_v44 = vpack.c.bf16 %v735_v41, %v734_v1 }
 0x431   :  { %v759_v2 = vpack.c.bf16 %v733_v7, %v732_v33  ;;  %v739_v7 = vld [vmem:[#allocation4 + $0x90] sm:$0xff] }
 0x433   :  { %1590 = vmatprep.mubr.bf16.mxu0 %v759_v2 }
 0x434   :  { %1591 = vmatmul.mubr.bf16.gmra.mxu0 %v760_v44 }
 0x4c4   :  { %v1580_v4 = vpop.f32.mrf.mxu0 }
 0x4c5   :  { %886 = vrot.lane.b32.xlu1 %v1580_v4, %s1837_s30 }
 0x4c6   :  { %v803_v48 = vpop.f32.mrf.mxu0 }
 0x4c7   :  { %882 = vrot.lane.b32.xlu0 %v803_v48, %s1837_s30 }
 0x4c8   :  { %v1581_v50 = vpop.f32.mrf.mxu0 }
 0x4c9   :  { %v1247_v46 = vpack.c.bf16 %v1581_v50, %v1580_v4  ;;  %971 = vperm.xlu1 %1655, %v1580_v4  }
 0x4ca   :  { %v806_v5 = vpop.f32.mrf.mxu0 }
 0x4cb   :  { %v1246_v16 = vpack.c.bf16 %v806_v5, %v803_v48  ;;  %888 = vrot.lane.b32.xlu0 %v1581_v50, %s1837_s30 }
 0x4cd   :  { %963 = vperm.xlu1 %1655, %v803_v48  }
 0x4cf   :  { %967 = vperm.xlu0 %1654, %v806_v5  }
 0x4d1   :  { %884 = vrot.lane.b32.xlu1 %v806_v5, %s1837_s30 }
 0x4d4   :  { %v1584_v10 = vpop.f32.mrf.mxu0 }
 0x4d5   :  { %894 = vrot.lane.b32.xlu1 %v1584_v10, %s1837_s30 }
 0x4d6   :  { %v819_v49 = vpop.f32.mrf.mxu0 }
 0x4d8   :  { %v1585_v55 = vpop.f32.mrf.mxu0 }
 0x4d9   :  { %890 = vrot.lane.b32.xlu1 %v819_v49, %s1837_s30  ;;  %896 = vrot.lane.b32.xlu0 %v1585_v55, %s1837_s30  ;;  %v1249_v30 = vpack.c.bf16 %v1585_v55, %v1584_v10 }
 0x4da   :  { %v822_v15 = vpop.f32.mrf.mxu0 }
 0x4db   :  { %v1248_v39 = vpack.c.bf16 %v822_v15, %v819_v49 }
 0x4dd   :  { %892 = vrot.lane.b32.xlu0 %v822_v15, %s1837_s30 }
 0x4e4   :  { %v1588_v17 = vpop.f32.mrf.mxu0 }
 0x4e5   :  { %902 = vrot.lane.b32.xlu1 %v1588_v17, %s1837_s30 }
 0x4e6   :  { %v835_v61 = vpop.f32.mrf.mxu0 }
 0x4e8   :  { %v1589_v19 = vpop.f32.mrf.mxu0 }
 0x4e9   :  { %898 = vrot.lane.b32.xlu1 %v835_v61, %s1837_s30  ;;  %904 = vrot.lane.b32.xlu0 %v1589_v19, %s1837_s30  ;;  %v1251_v20 = vpack.c.bf16 %v1589_v19, %v1588_v17 }
 0x4ea   :  { %v838_v21 = vpop.f32.mrf.mxu0 }
 0x4eb   :  { %v1250_v63 = vpack.c.bf16 %v838_v21, %v835_v61 }
 0x4ed   :  { %900 = vrot.lane.b32.xlu0 %v838_v21, %s1837_s30 }
 0x4f4   :  { %v1592_v3 = vpop.f32.mrf.mxu0 }
 0x4f5   :  { %910 = vrot.lane.b32.xlu1 %v1592_v3, %s1837_s30 }
 0x4f6   :  { %v851_v6 = vpop.f32.mrf.mxu0 }
 0x4f8   :  { %v1593_v23 = vpop.f32.mrf.mxu0 }
 0x4f9   :  { %v1253_v11 = vpack.c.bf16 %v1593_v23, %v1592_v3  ;;  %906 = vrot.lane.b32.xlu1 %v851_v6, %s1837_s30  ;;  %912 = vrot.lane.b32.xlu0 %v1593_v23, %s1837_s30 }
 0x4fa   :  { %v854_v26 = vpop.f32.mrf.mxu0 }
 0x4fb   :  { %v1252_v27 = vpack.c.bf16 %v854_v26, %v851_v6  ;;  %1594 = vmatprep.subr.bf16.mxu1 %v1253_v11 }
 0x4fc   :  { %1595 = vmatpush3.bf16.msra.mxu1 %v1253_v11  ;;  %v743_v11 = vld [vmem:[#allocation4 + $0xb0] sm:$0xff] }
 0x4fd   :  { %979 = vperm.xlu1 %1655, %v819_v49   ;;  %908 = vrot.lane.b32.xlu0 %v854_v26, %s1837_s30 }
 0x4fe   :  { %1596 = vmatprep.subr.bf16.mxu1 %v1252_v27 }
 0x500   :  { %1597 = vmatpush3.bf16.msra.mxu1 %v1252_v27 }
 0x501   :  { %987 = vperm.xlu1 %1655, %v1584_v10   ;;  %975 = vperm.xlu0 %1654, %v1581_v50   ;;  %v741_v10 = vld [vmem:[#allocation4 + $0xa0] sm:$0xff] }
 0x502   :  { %1598 = vmatprep.subr.bf16.mxu1 %v1251_v20 }
 0x504   :  { %1599 = vmatpush3.bf16.msra.mxu1 %v1251_v20 }
 0x505   :  { %995 = vperm.xlu1 %1655, %v835_v61   ;;  %983 = vperm.xlu0 %1654, %v822_v15  }
 0x506   :  { %1600 = vmatprep.subr.bf16.mxu1 %v1250_v63 }
 0x508   :  { %1601 = vmatpush3.bf16.msra.mxu1 %v1250_v63 }
 0x509   :  { %1003 = vperm.xlu1 %1655, %v1588_v17   ;;  %991 = vperm.xlu0 %1654, %v1585_v55  }
 0x50a   :  { %1602 = vmatprep.subr.bf16.mxu1 %v1249_v30 }
 0x50c   :  { %1603 = vmatpush3.bf16.msra.mxu1 %v1249_v30 }
 0x50d   :  { %1011 = vperm.xlu1 %1655, %v851_v6   ;;  %999 = vperm.xlu0 %1654, %v838_v21  }
 0x50e   :  { %1604 = vmatprep.subr.bf16.mxu1 %v1248_v39 }
 0x510   :  { %1605 = vmatpush3.bf16.msra.mxu1 %v1248_v39  ;;  %v744_v39 = vld [vmem:[#allocation4 + $0xb8] sm:$0xff] }
 0x511   :  { %1019 = vperm.xlu1 %1655, %v1592_v3   ;;  %1007 = vperm.xlu0 %1654, %v1589_v19   ;;  %v742_v19 = vld [vmem:[#allocation4 + $0xa8] sm:$0xff] }
 0x512   :  { %1606 = vmatprep.subr.bf16.mxu1 %v1247_v46 }
 0x514   :  { %1607 = vmatpush3.bf16.msra.mxu1 %v1247_v46 }
 0x515   :  { %1023 = vperm.xlu0 %1654, %v1593_v23   ;;  %1608 = vmatprep.subr.bf16.mxu1 %v1246_v16 }
 0x518   :  { %1609 = vmatpush3.bf16.msra.mxu1 %v1246_v16 }
 0x519   :  { %1015 = vperm.xlu0 %1654, %v854_v26  }
 0x537   :  { %v887_v25 = vpop.permute.xlu1 %886 }
 0x539   :  { %v883_v32 = vpop.permute.xlu0 %882 }
 0x53a   :  { %930 = vxpose.xlu1.b32.start [1/16] (narrow) %v883_v32, 8 }
 0x53d   :  { %v889_v9 = vpop.permute.xlu0 %888 }
 0x544   :  { %v972_v8 = vpop.permute.xlu1 %971 }
 0x548   :  { %v964_v35 = vpop.permute.xlu1 %963 }
 0x54a   :  { %v968_v12 = vpop.permute.xlu0 %967 }
 0x54c   :  { %v885_v31 = vpop.permute.xlu1 %884 }
 0x54d   :  { %931 = vxpose.xlu1.b32.cont [2/16] (narrow) %v885_v31, 8  ;;  %v745_v31 = vld [vmem:[#allocation4 + $0xc0] sm:$0xff] }
 0x54e   :  { %v897_v40 = vpop.permute.xlu0 %896 }
 0x550   :  { %v895_v38 = vpop.permute.xlu1 %894 }
 0x551   :  { %932 = vxpose.xlu1.b32.cont [3/16] (narrow) %v887_v25, 8 }
 0x552   :  { %v893_v43 = vpop.permute.xlu0 %892 }
 0x554   :  { %v891_v36 = vpop.permute.xlu1 %890 }
 0x555   :  { %933 = vxpose.xlu1.b32.cont [4/16] (narrow) %v889_v9, 8 }
 0x558   :  { %v903_v18 = vpop.permute.xlu1 %902 }
 0x559   :  { %934 = vxpose.xlu1.b32.cont [5/16] (narrow) %v891_v36, 8 }
 0x55b   :  { %v905_v45 = vpop.permute.xlu0 %904 }
 0x55c   :  { %v899_v22 = vpop.permute.xlu1 %898 }
 0x55d   :  { %935 = vxpose.xlu1.b32.cont [6/16] (narrow) %v893_v43, 8  ;;  %v746_v43 = vld [vmem:[#allocation4 + $0xc8] sm:$0xff] }
 0x55f   :  { %v901_v42 = vpop.permute.xlu0 %900 }
 0x561   :  { %936 = vxpose.xlu1.b32.cont [7/16] (narrow) %v895_v38, 8 }
 0x565   :  { %937 = vxpose.xlu1.b32.cont [8/16] (narrow) %v897_v40, 8 }
 0x567   :  { %v911_v47 = vpop.permute.xlu1 %910 }
 0x569   :  { %938 = vxpose.xlu1.b32.cont [9/16] (narrow) %v899_v22, 8 }
 0x56b   :  { %v913_v51 = vpop.permute.xlu0 %912  ;;  %v907_v52 = vpop.permute.xlu1 %906 }
 0x56d   :  { %939 = vxpose.xlu1.b32.cont [10/16] (narrow) %v901_v42, 8 }
 0x56f   :  { %v909_v24 = vpop.permute.xlu0 %908 }
 0x571   :  { %940 = vxpose.xlu1.b32.cont [11/16] (narrow) %v903_v18, 8 }
 0x575   :  { %941 = vxpose.xlu1.b32.cont [12/16] (narrow) %v905_v45, 8 }
 0x578   :  { %v980_v53 = vpop.permute.xlu1 %979 }
 0x579   :  { %942 = vxpose.xlu1.b32.cont [13/16] (narrow) %v907_v52, 8 }
 0x57c   :  { %v988_v29 = vpop.permute.xlu1 %987  ;;  %v976_v2 = vpop.permute.xlu0 %975 }
 0x57d   :  { %943 = vxpose.xlu1.b32.cont [14/16] (narrow) %v909_v24, 8 }
 0x580   :  { %v996_v54 = vpop.permute.xlu1 %995  ;;  %v984_v49 = vpop.permute.xlu0 %983 }
 0x581   :  { %944 = vxpose.xlu1.b32.cont [15/16] (narrow) %v911_v47, 8 }
 0x584   :  { %v2119_v56 = vpop.permute.xlu1 %1003  ;;  %v992_v26 = vpop.permute.xlu0 %991 }
 0x585   :  { %945 = vxpose.xlu1.b32.end [16/16] (narrow) %v913_v51, 8  ;;  %v747_v51 = vld [vmem:[#allocation4 + $0xd0] sm:$0xff] }
 0x588   :  { %v2121_v57 = vpop.permute.xlu1 %1011  ;;  %v1000_v9 = vpop.permute.xlu0 %999 }
 0x58c   :  { %v2123_v58 = vpop.permute.xlu1 %1019  ;;  %v1008_v18 = vpop.permute.xlu0 %1007 }
 0x5c5   :  { %v946_v34 = vpop.trf.xlu1 }
 0x5c6   :  { %v2127_v37 = vrot.slane %v946_v34, %v393_v14  ;;  %v740_v14 = vld [vmem:[#allocation4 + $0x98] sm:$0xff] }
 0x5c7   :  { %v748_v34 = vld [vmem:[#allocation4 + $0xd8] sm:$0xff] }
 0x5c8   :  { %v1030_v62 = vadd.f32 %v2127_v37, %v964_v35  ;;  %v1031_v28 = vadd.f32 %v2127_v37, %v968_v12  ;;  %v1032_v33 = vadd.f32 %v2127_v37, %v972_v8  ;;  %v1033_v13 = vadd.f32 %v2127_v37, %v976_v2  ;;  %v750_v2 = vld [vmem:[#allocation4 + $0xe8] sm:$0xff] }
 0x5c9   :  { %v1034_v16 = vadd.f32 %v2127_v37, %v980_v53  ;;  %v1035_v61 = vadd.f32 %v2127_v37, %v984_v49  ;;  %v1036_v23 = vadd.f32 %v2127_v37, %v988_v29  ;;  %v1037_v30 = vadd.f32 %v2127_v37, %v992_v26  ;;  %v752_v49 = vld [vmem:[#allocation4 + $0xf8] sm:$0xff] }
 0x5ca   :  { %v1046_v0 = vadd.f32 %v1030_v62, %v737_v59  ;;  %v1047_v41 = vadd.f32 %v1031_v28, %v738_v60  ;;  %v1048_v48 = vadd.f32 %v1032_v33, %v739_v7  ;;  %v1049_v5 = vadd.f32 %v1033_v13, %v740_v14  ;;  %v749_v28 = vld [vmem:[#allocation4 + $0xe0] sm:$0xff]  ;;  %v751_v14 = vld [vmem:[#allocation4 + $0xf0] sm:$0xff] }
 0x5cb   :  { %v1050_v17 = vadd.f32 %v1034_v16, %v741_v10  ;;  %v1051_v6 = vadd.f32 %v1035_v61, %v742_v19  ;;  %v1052_v63 = vadd.f32 %v1036_v23, %v743_v11  ;;  %v1053_v8 = vadd.f32 %v1037_v30, %v744_v39 }
 0x5cc   :  { %v1062_v1 = vmul.f32 0.2, %v1046_v0  ;;  %v1063_v4 = vmul.f32 0.2, %v1047_v41  ;;  %v1064_v46 = vmul.f32 0.2, %v1048_v48  ;;  %v1038_v35 = vadd.f32 %v2127_v37, %v996_v54  ;;  %v1024_v54 = vpop.permute.xlu0 %1023 }
 0x5cd   :  { %v1065_v15 = vmul.f32 0.2, %v1049_v5  ;;  %v1066_v3 = vmul.f32 0.2, %v1050_v17  ;;  %v1067_v20 = vmul.f32 0.2, %v1051_v6  ;;  %v1039_v36 = vadd.f32 %v2127_v37, %v1000_v9 }
 0x5ce   :  { %v2132_v44 = vmax.f32 %v1046_v0, %v1062_v1  ;;  %v2136_v50 = vmax.f32 %v1047_v41, %v1063_v4  ;;  %v2140_v55 = vmax.f32 %v1048_v48, %v1064_v46  ;;  %v1068_v25 = vmul.f32 0.2, %v1052_v63 }
 0x5cf   :  { %v2144_v21 = vmax.f32 %v1049_v5, %v1065_v15  ;;  %v2148_v27 = vmax.f32 %v1050_v17, %v1066_v3  ;;  %v2152_v32 = vmax.f32 %v1051_v6, %v1067_v20  ;;  %v1069_v38 = vmul.f32 0.2, %v1053_v8 }
 0x5d0   :  { %1094 = vmax.xlane.f32.xlu0 %v2132_v44  ;;  %v2156_v12 = vmax.f32 %v1052_v63, %v1068_v25  ;;  %v1054_v40 = vadd.f32 %v1038_v35, %v745_v31  ;;  %v1055_v42 = vadd.f32 %v1039_v36, %v746_v43  ;;  %v1040_v47 = vadd.f32 %v2127_v37, %v2119_v56  ;;  %v1016_v0 = vpop.permute.xlu0 %1015 }
 0x5d1   :  { %v2160_v45 = vmax.f32 %v1053_v8, %v1069_v38  ;;  %v1041_v29 = vadd.f32 %v2127_v37, %v1008_v18  ;;  %v1042_v56 = vadd.f32 %v2127_v37, %v2121_v57  ;;  %v1043_v1 = vadd.f32 %v2127_v37, %v1016_v0 }
 0x5d2   :  { %v1070_v22 = vmul.f32 0.2, %v1054_v40  ;;  %v1071_v24 = vmul.f32 0.2, %v1055_v42  ;;  %v1056_v53 = vadd.f32 %v1040_v47, %v747_v51  ;;  %v1044_v57 = vadd.f32 %v2127_v37, %v2123_v58 }
 0x5d3   :  { %v1057_v62 = vadd.f32 %v1041_v29, %v748_v34  ;;  %v1058_v7 = vadd.f32 %v1042_v56, %v749_v28  ;;  %v1059_v13 = vadd.f32 %v1043_v1, %v750_v2  ;;  %v1045_v10 = vadd.f32 %v2127_v37, %v1024_v54 }
 0x5d4   :  { %1096 = vmax.xlane.f32.xlu0 %v2136_v50  ;;  %v2165_v52 = vmax.f32 %v1054_v40, %v1070_v22  ;;  %v2169_v59 = vmax.f32 %v1055_v42, %v1071_v24  ;;  %v1072_v60 = vmul.f32 0.2, %v1056_v53  ;;  %v1060_v16 = vadd.f32 %v1044_v57, %v751_v14 }
 0x5d5   :  { %v1073_v33 = vmul.f32 0.2, %v1057_v62  ;;  %v1074_v48 = vmul.f32 0.2, %v1058_v7  ;;  %v1075_v5 = vmul.f32 0.2, %v1059_v13  ;;  %v1061_v61 = vadd.f32 %v1045_v10, %v752_v49 }
 0x5d6   :  { %v2174_v41 = vmax.f32 %v1056_v53, %v1072_v60  ;;  %v1076_v17 = vmul.f32 0.2, %v1060_v16 }
 0x5d7   :  { %v2178_v4 = vmax.f32 %v1057_v62, %v1073_v33  ;;  %v2183_v46 = vmax.f32 %v1058_v7, %v1074_v48  ;;  %v2187_v15 = vmax.f32 %v1059_v13, %v1075_v5  ;;  %v1077_v58 = vmul.f32 0.2, %v1061_v61 }
 0x5d8   :  { %1098 = vmax.xlane.f32.xlu0 %v2140_v55  ;;  %v2190_v19 = vmax.f32 %v1060_v16, %v1076_v17 }
 0x5d9   :  { %v2193_v3 = vmax.f32 %v1061_v61, %v1077_v58 }
 0x5dc   :  { %1100 = vmax.xlane.f32.xlu0 %v2144_v21 }
 0x5e0   :  { %1102 = vmax.xlane.f32.xlu0 %v2148_v27 }
 0x5e4   :  { %1104 = vmax.xlane.f32.xlu0 %v2152_v32 }
 0x5e8   :  { %1106 = vmax.xlane.f32.xlu0 %v2156_v12 }
 0x5ec   :  { %1108 = vmax.xlane.f32.xlu0 %v2160_v45 }
 0x5f0   :  { %1110 = vmax.xlane.f32.xlu0 %v2165_v52 }
 0x5f4   :  { %1112 = vmax.xlane.f32.xlu0 %v2169_v59 }
 0x5f8   :  { %1114 = vmax.xlane.f32.xlu0 %v2174_v41 }
 0x5fc   :  { %1116 = vmax.xlane.f32.xlu0 %v2178_v4 }
 0x600   :  { %1118 = vmax.xlane.f32.xlu0 %v2183_v46 }
 0x604   :  { %1120 = vmax.xlane.f32.xlu0 %v2187_v15 }
 0x608   :  { %1122 = vmax.xlane.f32.xlu0 %v2190_v19 }
 0x60c   :  { %1124 = vmax.xlane.f32.xlu0 %v2193_v3 }
 0x659   :  { %v1095_v6 = vpop.xlane.xlu0 %1094 }
 0x65a   :  { %v1126_v37 = vsub.f32 %v2132_v44, %v1095_v6 }
 0x65c   :  { %v1142_v23 = vmul.f32 1.442695, %v1126_v37 }
 0x65d   :  { %v1097_v11 = vpop.xlane.xlu0 %1096 }
 0x65e   :  { %1720 = vpow2.f32 %v1142_v23  ;;  %v1127_v26 = vsub.f32 %v2136_v50, %v1097_v11 }
 0x660   :  { %v1144_v20 = vmul.f32 1.442695, %v1127_v26 }
 0x661   :  { %v1099_v63 = vpop.xlane.xlu0 %1098 }
 0x662   :  { %1722 = vpow2.f32 %v1144_v20  ;;  %v1128_v30 = vsub.f32 %v2140_v55, %v1099_v63 }
 0x664   :  { %v1146_v39 = vmul.f32 1.442695, %v1128_v30 }
 0x665   :  { %v1101_v25 = vpop.xlane.xlu0 %1100 }
 0x666   :  { %1724 = vpow2.f32 %v1146_v39  ;;  %v1129_v8 = vsub.f32 %v2144_v21, %v1101_v25 }
 0x668   :  { %v1148_v35 = vmul.f32 1.442695, %v1129_v8 }
 0x669   :  { %v1103_v9 = vpop.xlane.xlu0 %1102 }
 0x66a   :  { %1726 = vpow2.f32 %v1148_v35  ;;  %v1130_v44 = vsub.f32 %v2148_v27, %v1103_v9 }
 0x66b   :  { %v2201_v31 = vpop.eup %1720 }
 0x66c   :  { %v1150_v38 = vmul.f32 1.442695, %v1130_v44  ;;  %1174 = vadd.xlane.f32.xlu0 %v2201_v31 }
 0x66d   :  { %v1105_v50 = vpop.xlane.xlu0 %1104 }
 0x66e   :  { %1728 = vpow2.f32 %v1150_v38  ;;  %v1131_v40 = vsub.f32 %v2152_v32, %v1105_v50 }
 0x66f   :  { %v2205_v55 = vpop.eup %1722 }
 0x670   :  { %v1152_v36 = vmul.f32 1.442695, %v1131_v40  ;;  %1176 = vadd.xlane.f32.xlu0 %v2205_v55 }
 0x671   :  { %v1107_v21 = vpop.xlane.xlu0 %1106 }
 0x672   :  { %1730 = vpow2.f32 %v1152_v36  ;;  %v1132_v43 = vsub.f32 %v2156_v12, %v1107_v21 }
 0x673   :  { %v2209_v18 = vpop.eup %1724 }
 0x674   :  { %v1154_v27 = vmul.f32 1.442695, %v1132_v43  ;;  %1178 = vadd.xlane.f32.xlu1 %v2209_v18 }
 0x675   :  { %v1109_v22 = vpop.xlane.xlu0 %1108 }
 0x676   :  { %1732 = vpow2.f32 %v1154_v27  ;;  %v1133_v42 = vsub.f32 %v2160_v45, %v1109_v22 }
 0x677   :  { %v2213_v47 = vpop.eup %1726 }
 0x678   :  { %v1156_v32 = vmul.f32 1.442695, %v1133_v42  ;;  %1180 = vadd.xlane.f32.xlu0 %v2213_v47 }
 0x679   :  { %v1111_v51 = vpop.xlane.xlu0 %1110 }
 0x67a   :  { %1734 = vpow2.f32 %v1156_v32  ;;  %v1134_v24 = vsub.f32 %v2165_v52, %v1111_v51 }
 0x67b   :  { %v2217_v53 = vpop.eup %1728 }
 0x67c   :  { %v1158_v12 = vmul.f32 1.442695, %v1134_v24  ;;  %1182 = vadd.xlane.f32.xlu0 %v2217_v53 }
 0x67d   :  { %v1113_v29 = vpop.xlane.xlu0 %1112 }
 0x67e   :  { %1736 = vpow2.f32 %v1158_v12  ;;  %v1135_v54 = vsub.f32 %v2169_v59, %v1113_v29 }
 0x67f   :  { %v2221_v34 = vpop.eup %1730 }
 0x680   :  { %v1160_v45 = vmul.f32 1.442695, %v1135_v54  ;;  %1184 = vadd.xlane.f32.xlu0 %v2221_v34 }
 0x681   :  { %v1115_v60 = vpop.xlane.xlu0 %1114 }
 0x682   :  { %1738 = vpow2.f32 %v1160_v45  ;;  %v1136_v62 = vsub.f32 %v2174_v41, %v1115_v60 }
 0x683   :  { %v2225_v56 = vpop.eup %1732 }
 0x684   :  { %v1162_v52 = vmul.f32 1.442695, %v1136_v62  ;;  %1186 = vadd.xlane.f32.xlu0 %v2225_v56 }
 0x685   :  { %v1117_v28 = vpop.xlane.xlu0 %1116 }
 0x686   :  { %1740 = vpow2.f32 %v1162_v52  ;;  %v1137_v0 = vsub.f32 %v2178_v4, %v1117_v28 }
 0x687   :  { %v2229_v33 = vpop.eup %1734 }
 0x688   :  { %v1164_v59 = vmul.f32 1.442695, %v1137_v0  ;;  %1188 = vadd.xlane.f32.xlu0 %v2229_v33 }
 0x689   :  { %v1119_v7 = vpop.xlane.xlu0 %1118 }
 0x68a   :  { %1742 = vpow2.f32 %v1164_v59  ;;  %v1138_v1 = vsub.f32 %v2183_v46, %v1119_v7 }
 0x68b   :  { %v2233_v2 = vpop.eup %1736 }
 0x68c   :  { %v1166_v41 = vmul.f32 1.442695, %v1138_v1  ;;  %1190 = vadd.xlane.f32.xlu0 %v2233_v2 }
 0x68d   :  { %v1121_v48 = vpop.xlane.xlu0 %1120 }
 0x68e   :  { %1744 = vpow2.f32 %v1166_v41  ;;  %v1139_v13 = vsub.f32 %v2187_v15, %v1121_v48 }
 0x68f   :  { %v2237_v57 = vpop.eup %1738 }
 0x690   :  { %v1168_v4 = vmul.f32 1.442695, %v1139_v13  ;;  %1192 = vadd.xlane.f32.xlu0 %v2237_v57 }
 0x691   :  { %v1123_v14 = vpop.xlane.xlu0 %1122 }
 0x692   :  { %1746 = vpow2.f32 %v1168_v4  ;;  %v1140_v5 = vsub.f32 %v2190_v19, %v1123_v14 }
 0x693   :  { %v2241_v16 = vpop.eup %1740 }
 0x694   :  { %v1170_v46 = vmul.f32 1.442695, %v1140_v5  ;;  %1194 = vadd.xlane.f32.xlu0 %v2241_v16 }
 0x695   :  { %v1125_v10 = vpop.xlane.xlu0 %1124 }
 0x696   :  { %1748 = vpow2.f32 %v1170_v46  ;;  %v1141_v49 = vsub.f32 %v2193_v3, %v1125_v10  ;;  %v1838_v10 = vmov 0.0  }
 0x697   :  { %v2245_v17 = vpop.eup %1742  ;;  %1626 = vmatprep.subr.bf16.mxu0 %v1838_v10  ;;  %1642 = vmatprep.mubr.msk.bf16.mxu0 %vm1839_vm1, %v1838_v10 }
 0x698   :  { %v1172_v15 = vmul.f32 1.442695, %v1141_v49  ;;  %1196 = vadd.xlane.f32.xlu0 %v2245_v17 }
 0x69a   :  { %1750 = vpow2.f32 %v1172_v15 }
 0x69b   :  { %v2248_v61 = vpop.eup %1744 }
 0x69c   :  { %1198 = vadd.xlane.f32.xlu0 %v2248_v61 }
 0x69f   :  { %v2251_v19 = vpop.eup %1746 }
 0x6a0   :  { %1200 = vadd.xlane.f32.xlu1 %v2251_v19 }
 0x6a3   :  { %v2254_v58 = vpop.eup %1748 }
 0x6a4   :  { %1202 = vadd.xlane.f32.xlu0 %v2254_v58 }
 0x6a7   :  { %v2257_v6 = vpop.eup %1750 }
 0x6a8   :  { %1204 = vadd.xlane.f32.xlu1 %v2257_v6 }
 0x6f5   :  { %v1175_v3 = vpop.xlane.xlu0 %1174 }
 0x6f6   :  { %1752 = vrcp.f32 %v1175_v3 }
 0x6f9   :  { %v1177_v37 = vpop.xlane.xlu0 %1176 }
 0x6fa   :  { %1754 = vrcp.f32 %v1177_v37 }
 0x6fd   :  { %v1179_v23 = vpop.xlane.xlu1 %1178 }
 0x6fe   :  { %1756 = vrcp.f32 %v1179_v23 }
 0x701   :  { %v1181_v11 = vpop.xlane.xlu0 %1180 }
 0x702   :  { %1758 = vrcp.f32 %v1181_v11 }
 0x703   :  { %v1753_v26 = vpop.eup %1752 }
 0x704   :  { %v1207_v30 = vmul.f32 %v1753_v26, %v2201_v31 }
 0x705   :  { %v1183_v20 = vpop.xlane.xlu0 %1182 }
 0x706   :  { %1760 = vrcp.f32 %v1183_v20 }
 0x707   :  { %v1755_v63 = vpop.eup %1754 }
 0x708   :  { %v1209_v39 = vmul.f32 %v1755_v63, %v2205_v55 }
 0x709   :  { %v1185_v25 = vpop.xlane.xlu0 %1184 }
 0x70a   :  { %1762 = vrcp.f32 %v1185_v25  ;;  %v1238_v8 = vpack.c.bf16 %v1209_v39, %v1207_v30  ;;  %v1443_v30 = vld [vmem:[#allocation2 + $0x91] ss:$0 sm:$0xff] }
 0x70b   :  { %v1757_v35 = vpop.eup %1756 }
 0x70c   :  { %1610 = vmatprep.mubr.bf16.mxu1 %v1238_v8  ;;  %v1211_v38 = vmul.f32 %v1757_v35, %v2209_v18 }
 0x70d   :  { %v1187_v9 = vpop.xlane.xlu0 %1186 }
 0x70e   :  { %1764 = vrcp.f32 %v1187_v9 }
 0x70f   :  { %v1759_v44 = vpop.eup %1758 }
 0x710   :  { %v1213_v50 = vmul.f32 %v1759_v44, %v2213_v47 }
 0x711   :  { %v1189_v40 = vpop.xlane.xlu0 %1188 }
 0x712   :  { %1766 = vrcp.f32 %v1189_v40  ;;  %v1239_v36 = vpack.c.bf16 %v1213_v50, %v1211_v38 }
 0x713   :  { %v1761_v21 = vpop.eup %1760 }
 0x714   :  { %1611 = vmatmul.mubr.bf16.vlgmr.msra.gmra.mxu1 %v1239_v36  ;;  %v1215_v55 = vmul.f32 %v1761_v21, %v2217_v53 }
 0x715   :  { %v1191_v31 = vpop.xlane.xlu0 %1190 }
 0x716   :  { %1768 = vrcp.f32 %v1191_v31 }
 0x717   :  { %v1763_v43 = vpop.eup %1762 }
 0x718   :  { %v1217_v27 = vmul.f32 %v1763_v43, %v2221_v34 }
 0x719   :  { %v1193_v22 = vpop.xlane.xlu0 %1192 }
 0x71a   :  { %1770 = vrcp.f32 %v1193_v22  ;;  %v1240_v42 = vpack.c.bf16 %v1217_v27, %v1215_v55 }
 0x71b   :  { %v1765_v32 = vpop.eup %1764 }
 0x71c   :  { %1614 = vmatprep.mubr.bf16.mxu1 %v1240_v42  ;;  %v1219_v47 = vmul.f32 %v1765_v32, %v2225_v56 }
 0x71d   :  { %v1195_v18 = vpop.xlane.xlu0 %1194 }
 0x71e   :  { %1772 = vrcp.f32 %v1195_v18 }
 0x71f   :  { %v1767_v51 = vpop.eup %1766 }
 0x720   :  { %v1221_v24 = vmul.f32 %v1767_v51, %v2229_v33 }
 0x721   :  { %v1197_v12 = vpop.xlane.xlu0 %1196 }
 0x722   :  { %1774 = vrcp.f32 %v1197_v12  ;;  %v1241_v29 = vpack.c.bf16 %v1221_v24, %v1219_v47 }
 0x723   :  { %v1769_v54 = vpop.eup %1768 }
 0x724   :  { %1615 = vmatmul.mubr.bf16.gmra.mxu1 %v1241_v29  ;;  %v1223_v34 = vmul.f32 %v1769_v54, %v2233_v2 }
 0x725   :  { %v1199_v53 = vpop.xlane.xlu0 %1198 }
 0x726   :  { %1776 = vrcp.f32 %v1199_v53  ;;  %v1355_v53 = vld [vmem:[%s2291_s3] sm:$0xff] }
 0x727   :  { %v1771_v45 = vpop.eup %1770 }
 0x728   :  { %v1225_v60 = vmul.f32 %v1771_v45, %v2237_v57  ;;  %v1356_v45 = vld [vmem:[%s2291_s3 + $0x8] sm:$0xff] }
 0x729   :  { %v1201_v62 = vpop.xlane.xlu1 %1200 }
 0x72a   :  { %1778 = vrcp.f32 %v1201_v62  ;;  %v1242_v52 = vpack.c.bf16 %v1225_v60, %v1223_v34  ;;  %v1357_v60 = vpack.c.bf16 %v1356_v45, %v1355_v53  ;;  %v1444_v62 = vld [vmem:[#allocation2 + $0x92] ss:$0 sm:$0xff] }
 0x72b   :  { %v1773_v28 = vpop.eup %1772 }
 0x72c   :  { %1618 = vmatprep.mubr.bf16.mxu1 %v1242_v52  ;;  %v1227_v33 = vmul.f32 %v1773_v28, %v2241_v16 }
 0x72d   :  { %v1203_v56 = vpop.xlane.xlu0 %1202 }
 0x72e   :  { %1780 = vrcp.f32 %v1203_v56 }
 0x72f   :  { %v1775_v0 = vpop.eup %1774 }
 0x730   :  { %v1229_v59 = vmul.f32 %v1775_v0, %v2245_v17 }
 0x731   :  { %v1205_v7 = vpop.xlane.xlu1 %1204 }
 0x732   :  { %1782 = vrcp.f32 %v1205_v7  ;;  %v1243_v1 = vpack.c.bf16 %v1229_v59, %v1227_v33  ;;  %v1445_v7 = vld [vmem:[#allocation2 + $0x93] ss:$0 sm:$0xff] }
 0x733   :  { %v1777_v41 = vpop.eup %1776 }
 0x734   :  { %1619 = vmatmul.mubr.bf16.gmra.mxu1 %v1243_v1  ;;  %v1231_v48 = vmul.f32 %v1777_v41, %v2248_v61 }
 0x737   :  { %v1779_v2 = vpop.eup %1778 }
 0x738   :  { %v1233_v13 = vmul.f32 %v1779_v2, %v2251_v19 }
 0x73a   :  { %v1244_v57 = vpack.c.bf16 %v1233_v13, %v1231_v48 }
 0x73b   :  { %v1781_v4 = vpop.eup %1780 }
 0x73c   :  { %1622 = vmatprep.mubr.bf16.mxu1 %v1244_v57  ;;  %v1235_v5 = vmul.f32 %v1781_v4, %v2254_v58 }
 0x73f   :  { %v1783_v14 = vpop.eup %1782 }
 0x740   :  { %v1237_v16 = vmul.f32 %v1783_v14, %v2257_v6 }
 0x742   :  { %v1245_v46 = vpack.c.bf16 %v1237_v16, %v1235_v5 }
 0x744   :  { %1623 = vmatmul.mubr.bf16.gmra.mxu1 %v1245_v46 }
 0x7d4   :  { %v1612_v49 = vpop.f32.mrf.mxu1 }
 0x7d5   :  { %v1301_v24 = vadd.f32 %v1612_v49, %v1443_v30 }
 0x7d6   :  { %v1292_v17 = vpop.f32.mrf.mxu1 }
 0x7d7   :  { %v1293_v54 = vadd.f32 %v1443_v30, %v1292_v17 }
 0x7d8   :  { %v1613_v15 = vpop.f32.mrf.mxu1 }
 0x7d9   :  { %v1304_v51 = vadd.f32 %v1613_v15, %v1443_v30 }
 0x7da   :  { %v1295_v61 = vpop.f32.mrf.mxu1 }
 0x7db   :  { %v1359_v12 = vpack.c.bf16 %v1304_v51, %v1301_v24  ;;  %v1296_v29 = vadd.f32 %v1443_v30, %v1295_v61 }
 0x7dd   :  { %v1358_v34 = vpack.c.bf16 %v1296_v29, %v1293_v54 }
 0x7e4   :  { %v1616_v3 = vpop.f32.mrf.mxu1 }
 0x7e5   :  { %v1317_v22 = vadd.f32 %v1616_v3, %v1443_v30 }
 0x7e6   :  { %v1308_v19 = vpop.f32.mrf.mxu1 }
 0x7e7   :  { %v1309_v18 = vadd.f32 %v1443_v30, %v1308_v19 }
 0x7e8   :  { %v1617_v37 = vpop.f32.mrf.mxu1 }
 0x7e9   :  { %v1320_v55 = vadd.f32 %v1617_v37, %v1443_v30 }
 0x7ea   :  { %v1311_v23 = vpop.f32.mrf.mxu1 }
 0x7eb   :  { %v1361_v42 = vpack.c.bf16 %v1320_v55, %v1317_v22  ;;  %v1312_v32 = vadd.f32 %v1443_v30, %v1311_v23 }
 0x7ed   :  { %v1360_v47 = vpack.c.bf16 %v1312_v32, %v1309_v18 }
 0x7f4   :  { %v1620_v11 = vpop.f32.mrf.mxu1 }
 0x7f5   :  { %v1333_v36 = vadd.f32 %v1620_v11, %v1443_v30 }
 0x7f6   :  { %v1324_v26 = vpop.f32.mrf.mxu1 }
 0x7f7   :  { %v1325_v43 = vadd.f32 %v1443_v30, %v1324_v26 }
 0x7f8   :  { %v1621_v20 = vpop.f32.mrf.mxu1 }
 0x7f9   :  { %v1336_v50 = vadd.f32 %v1621_v20, %v1443_v30 }
 0x7fa   :  { %v1327_v58 = vpop.f32.mrf.mxu1 }
 0x7fb   :  { %v1363_v21 = vpack.c.bf16 %v1336_v50, %v1333_v36  ;;  %v1328_v31 = vadd.f32 %v1443_v30, %v1327_v58 }
 0x7fd   :  { %v1362_v27 = vpack.c.bf16 %v1328_v31, %v1325_v43 }
 0x804   :  { %v1624_v63 = vpop.f32.mrf.mxu1 }
 0x805   :  { %v1349_v25 = vadd.f32 %v1624_v63, %v1443_v30 }
 0x806   :  { %v1340_v6 = vpop.f32.mrf.mxu1 }
 0x807   :  { %v1341_v38 = vadd.f32 %v1443_v30, %v1340_v6 }
 0x808   :  { %v1625_v39 = vpop.f32.mrf.mxu1 }
 0x809   :  { %v1352_v8 = vadd.f32 %v1625_v39, %v1443_v30 }
 0x80a   :  { %v1343_v35 = vpop.f32.mrf.mxu1 }
 0x80b   :  { %v1365_v9 = vpack.c.bf16 %v1352_v8, %v1349_v25  ;;  %v1344_v44 = vadd.f32 %v1443_v30, %v1343_v35 }
 0x80d   :  { %1627 = vmatpush3.bf16.msra.mxu0 %v1365_v9  ;;  %v1364_v40 = vpack.c.bf16 %v1344_v44, %v1341_v38 }
 0x80e   :  { %1628 = vmatprep.subr.bf16.mxu0 %v1838_v10 }
 0x811   :  { %1629 = vmatpush3.bf16.msra.mxu0 %v1364_v40 }
 0x812   :  { %1630 = vmatprep.subr.bf16.mxu0 %v1838_v10 }
 0x815   :  { %1631 = vmatpush3.bf16.msra.mxu0 %v1363_v21 }
 0x816   :  { %1632 = vmatprep.subr.bf16.mxu0 %v1838_v10 }
 0x819   :  { %1633 = vmatpush3.bf16.msra.mxu0 %v1362_v27 }
 0x81a   :  { %1634 = vmatprep.subr.bf16.mxu0 %v1838_v10 }
 0x81d   :  { %1635 = vmatpush3.bf16.msra.mxu0 %v1361_v42 }
 0x81e   :  { %1636 = vmatprep.subr.bf16.mxu0 %v1838_v10 }
 0x821   :  { %1637 = vmatpush3.bf16.msra.mxu0 %v1360_v47 }
 0x822   :  { %1638 = vmatprep.subr.bf16.mxu0 %v1838_v10 }
 0x825   :  { %1639 = vmatpush3.bf16.msra.mxu0 %v1359_v12 }
 0x826   :  { %1640 = vmatprep.subr.bf16.mxu0 %v1838_v10 }
 0x829   :  { %1641 = vmatpush3.bf16.msra.mxu0 %v1358_v34 }
 0x82c   :  { %1643 = vmatmul.mubr.bf16.vlgmr.msra.gmra.mxu0 %v1357_v60 }
 0x8ec   :  { %v1400_v52 = vpop.f32.mrf.mxu0 }
 0x8ed   :  { %v1411_v28 = vmul.f32 %v1444_v62, %v1400_v52 }
 0x8ee   :  { %v1644_v56 = vpop.f32.mrf.mxu0 }
 0x8ef   :  { %1413 = vadd.xlane.f32.xlu0 %v1411_v28 }
 0x8f0   :  { %v1403_v0 = vpop.f32.mrf.mxu0 }
 0x8f1   :  { %v1412_v33 = vmul.f32 %v1444_v62, %v1403_v0 }
 0x8f2   :  { %v1645_v59 = vpop.f32.mrf.mxu0 }
 0x8f3   :  { %1415 = vadd.xlane.f32.xlu1 %v1412_v33 }
 0x978   :  { %v1414_v1 = vpop.xlane.xlu0 %1413 }
 0x979   :  { %v1421_v41 = vadd.f32 %v1445_v7, %v1414_v1 }
 0x97b   :  { %1784 = vtanh.f32 %v1421_v41 }
 0x97c   :  { %v1416_v2 = vpop.xlane.xlu1 %1415 }
 0x97d   :  { %v1422_v48 = vadd.f32 %v1445_v7, %v1416_v2 }
 0x97f   :  { %1786 = vtanh.f32 %v1422_v48 }
 0x988   :  { %v1785_v13 = vpop.eup %1784 }
 0x989   :  { %1426 = vst.msk [vmem:[%s2292_s4] sm:$0xff] %vm1425_vm2, %v1785_v13 }
 0x98c   :  { %v1787_v57 = vpop.eup %1786 }
 0x98d   :  { %1427 = vst.msk [vmem:[%s2292_s4 + $0x8] sm:$0xff] %vm1425_vm2, %v1787_v57 }
 0x98e   :  { %1432 = vsyncpa [#allocation3], 1 }
 0x98f   :  { %1433 = vsyncpa [#allocation5], 1 }

</bundles_post_ra>
